<compile_context>
chip_gen: v5e
topology: v5e:2x2
jax: 0.10.0
libtpu: 0.0.40
codegen_flags: <defaults>
</compile_context>

<pallas_src>
import functools

import jax
import jax.numpy as jnp
from jax.experimental import pallas as pl
from jax.experimental.pallas import tpu as pltpu


# ------------------------------------------------------------------ utilities

def _vmem_limit_bytes():
    """Generation-aware VMEM budget: ~3/4 of physical, capped at 100 MiB.

    v7x (64 MiB physical) -> 48 MiB; v5e/v6e (128 MiB) -> 96 MiB.
    """
    cap = 64 * 1024 * 1024
    try:
        cap = int(pltpu.get_tpu_info().vmem_capacity_bytes)
    except Exception:
        pass
    return max(32 * 1024 * 1024, min(cap * 3 // 4, 100 * 1024 * 1024))


def _const_spec(shape):
    """Grid-invariant operand: full block, constant index map, single-buffered."""
    index_map = lambda *_: (0,) * len(shape)
    try:
        return pl.BlockSpec(shape, index_map, pipeline_mode=pl.Buffered(1))
    except TypeError:  # pallas version without pipeline_mode kwarg
        return pl.BlockSpec(shape, index_map)


def _seq_tile(n):
    """Sequence tile: prefer 256 / 128 (lane-dense, many pipeline steps)."""
    for t in (256, 128):
        if n % t == 0:
            return t
    # TODO(synk): pad ragged sequence lengths to a multiple of 128 instead of
    # falling back to one whole-sequence tile.
    return n


def _row_tiling(rows):
    """(tile, padded_rows) for the flattened [rows, E] FFN slab."""
    if rows % 256 == 0:
        return 256, rows
    if rows % 128 == 0:
        return 128, rows
    if rows > 128:
        return 128, ((rows + 127) // 128) * 128          # pad to full 128-row tiles
    t = ((rows + 7) // 8) * 8                             # tiny case: one sublane-aligned tile
    return t, t


# ------------------------------------------------------------------ kernels

def _mha_add_ln_kernel(xq_ref, xkv_ref, wq_ref, bq_ref, wkv_ref, bkv_ref,
                       wo_ref, bo_ref, g_ref, beta_ref, out_ref,
                       q_scr, m_scr, l_scr, acc_scr,
                       *, num_heads, head_dim, eps):
    """out = LayerNorm(x_q + MHA(x_q, x_kv, x_kv)) with flash (online-softmax) K/V tiling.

    Grid = (batch, q_tile, kv_tile); kv_tile is the innermost "arbitrary" reduction axis.
    """
    ki = pl.program_id(2)
    embed_dim = num_heads * head_dim

    # ---- init per (batch, q-tile): Q projection + online-softmax state ------------
    @pl.when(ki == 0)
    def _init():
        xq = xq_ref[0].astype(jnp.bfloat16)                              # (tq, E)
        q = jnp.dot(xq, wq_ref[...],
                    preferred_element_type=jnp.float32) + bq_ref[...]
        q = q * (head_dim ** -0.5)           # fold 1/sqrt(head_dim) into q (O(Sq*E))
        q_scr[...] = q.reshape(q.shape[0], num_heads, head_dim).astype(jnp.bfloat16)
        m_scr[...] = jnp.full_like(m_scr, -jnp.inf)
        l_scr[...] = jnp.zeros_like(l_scr)
        acc_scr[...] = jnp.zeros_like(acc_scr)

    # ---- K/V projection for this kv tile: one fused (E, 2E) matmul ---------------
    xkv = xkv_ref[0].astype(jnp.bfloat16)                                # (tk, E)
    kv = jnp.dot(xkv, wkv_ref[...],
                 preferred_element_type=jnp.float32) + bkv_ref[...]      # (tk, 2E)
    tk = kv.shape[0]
    # TODO(synk): head split with head_dim < 128 forces a lane relayout; for production
    # store projection weights as (E, H, 128) (padded head dim) or loop over lane-aligned
    # per-head chunks instead of reshaping.
    kh = kv[:, :embed_dim].reshape(tk, num_heads, head_dim).astype(jnp.bfloat16)
    vh = kv[:, embed_dim:].reshape(tk, num_heads, head_dim).astype(jnp.bfloat16)

    # ---- online-softmax update (f32) ---------------------------------------------
    s = jnp.einsum('qhd,khd->hqk', q_scr[...], kh,
                   preferred_element_type=jnp.float32)                   # (H, tq, tk)
    m_new = jnp.maximum(m_scr[...], jnp.max(s, axis=-1, keepdims=True))
    alpha = jnp.exp(m_scr[...] - m_new)
    p = jnp.exp(s - m_new)
    l_scr[...] = alpha * l_scr[...] + jnp.sum(p, axis=-1, keepdims=True)
    acc_scr[...] = alpha * acc_scr[...] + jnp.einsum(
        'hqk,khd->hqd', p.astype(jnp.bfloat16), vh,
        preferred_element_type=jnp.float32)
    m_scr[...] = m_new
    # TODO(synk): attention dropout skipped (eval-mode identity); mask==None path only.

    # ---- epilogue: out-proj + residual + LayerNorm --------------------------------
    @pl.when(ki == pl.num_programs(2) - 1)
    def _epilogue():
        attn = acc_scr[...] * pl.reciprocal(l_scr[...], approx=True)     # (H, tq, hd)
        tq = attn.shape[1]
        attn = jnp.swapaxes(attn, 0, 1).reshape(tq, embed_dim)           # (tq, E)
        proj = jnp.dot(attn.astype(jnp.bfloat16), wo_ref[...],
                       preferred_element_type=jnp.float32) + bo_ref[...]
        y = xq_ref[0].astype(jnp.float32) + proj
        mu = jnp.mean(y, axis=-1, keepdims=True)
        var = jnp.mean((y - mu) * (y - mu), axis=-1, keepdims=True)
        yn = (y - mu) * jax.lax.rsqrt(var + eps)
        out_ref[0] = (yn * g_ref[...] + beta_ref[...]).astype(out_ref.dtype)


def _ffn_add_ln_kernel(x_ref, w1_ref, b1_ref, w2_ref, b2_ref, g_ref, beta_ref,
                       o_ref, *, eps):
    """out = LayerNorm(x + ReLU(x @ W1 + b1) @ W2 + b2) over a [rows, E] tile."""
    x = x_ref[...]                                     # (tm, E) f32 -- also the residual
    h = jnp.dot(x.astype(jnp.bfloat16), w1_ref[...],
                preferred_element_type=jnp.float32) + b1_ref[...]
    h = jnp.maximum(h, 0.0)
    ff = jnp.dot(h.astype(jnp.bfloat16), w2_ref[...],
                 preferred_element_type=jnp.float32) + b2_ref[...]

    y = x.astype(jnp.float32) + ff
    mu = jnp.mean(y, axis=-1, keepdims=True)
    var = jnp.mean((y - mu) * (y - mu), axis=-1, keepdims=True)
    yn = (y - mu) * jax.lax.rsqrt(var + eps)
    o_ref[...] = (yn * g_ref[...] + beta_ref[...]).astype(o_ref.dtype)


# ------------------------------------------------------------------ wrappers

def fused_mha_add_ln(x_q, x_kv, wq, bq, wkv, bkv, wo, bo, gamma, beta,
                     *, num_heads, eps=1e-5):
    """LayerNorm(x_q + MultiHeadAttention(x_q, x_kv, x_kv)) — flash-tiled Pallas kernel.

    Weights must already be bf16; wkv / bkv are the concatenated K|V projections.
    """
    B, Sq, E = x_q.shape
    Sk = x_kv.shape[1]
    head_dim = E // num_heads
    tq = _seq_tile(Sq)
    tk = _seq_tile(Sk)

    kernel = functools.partial(_mha_add_ln_kernel, num_heads=num_heads,
                               head_dim=head_dim, eps=eps)
    # TODO(synk): self-attention DMAs the same activation twice (q-tile + kv-tile views);
    # a dedicated single-input self-attn variant and input_output_aliases={0: 0} for the
    # residual would cut activation HBM traffic once buffer-lifetime is guaranteed.
    return pl.pallas_call(
        kernel,
        out_shape=jax.ShapeDtypeStruct((B, Sq, E), x_q.dtype),
        grid_spec=pltpu.PrefetchScalarGridSpec(
            num_scalar_prefetch=0,
            grid=(B, Sq // tq, Sk // tk),
            in_specs=[
                pl.BlockSpec((1, tq, E), lambda b, qi, ki: (b, qi, 0)),   # x_q / residual
                pl.BlockSpec((1, tk, E), lambda b, qi, ki: (b, ki, 0)),   # x_kv
                _const_spec(wq.shape), _const_spec(bq.shape),
                _const_spec(wkv.shape), _const_spec(bkv.shape),
                _const_spec(wo.shape), _const_spec(bo.shape),
                _const_spec(gamma.shape), _const_spec(beta.shape),
            ],
            out_specs=pl.BlockSpec((1, tq, E), lambda b, qi, ki: (b, qi, 0)),
            scratch_shapes=[
                pltpu.VMEM((tq, num_heads, head_dim), jnp.bfloat16),   # q (scaled)
                pltpu.VMEM((num_heads, tq, 1), jnp.float32),           # m (running max)
                pltpu.VMEM((num_heads, tq, 1), jnp.float32),           # l (running denom)
                pltpu.VMEM((num_heads, tq, head_dim), jnp.float32),    # acc
            ]),
        compiler_params=pltpu.CompilerParams(
            dimension_semantics=("parallel", "parallel", "arbitrary"),
            vmem_limit_bytes=_vmem_limit_bytes()),
    )(x_q, x_kv, wq, bq, wkv, bkv, wo, bo, gamma, beta)


def fused_ffn_add_ln(x, w1, b1, w2, b2, gamma, beta, *, eps=1e-5):
    """LayerNorm(x + FFN(x)) over the flattened [B*S, E] rows. w1/w2 already bf16."""
    B, S, E = x.shape
    rows = B * S
    x2 = x.reshape(rows, E)
    tm, rows_p = _row_tiling(rows)
    if rows_p != rows:
        x2 = jnp.pad(x2, ((0, rows_p - rows), (0, 0)))
    kernel = functools.partial(_ffn_add_ln_kernel, eps=eps)
    # TODO(synk): for very large dim_feedforward (v7x 64 MiB VMEM) add a reduction grid
    # axis over the hidden dim and stream W1/W2 K-tiles with an f32 accumulator.
    out2 = pl.pallas_call(
        kernel,
        out_shape=jax.ShapeDtypeStruct((rows_p, E), x.dtype),
        grid_spec=pltpu.PrefetchScalarGridSpec(
            num_scalar_prefetch=0,
            grid=(rows_p // tm,),
            in_specs=[
                pl.BlockSpec((tm, E), lambda i: (i, 0)),
                _const_spec(w1.shape), _const_spec(b1.shape),
                _const_spec(w2.shape), _const_spec(b2.shape),
                _const_spec(gamma.shape), _const_spec(beta.shape),
            ],
            out_specs=pl.BlockSpec((tm, E), lambda i: (i, 0)),
        ),
        compiler_params=pltpu.CompilerParams(
            dimension_semantics=("parallel",),
            vmem_limit_bytes=_vmem_limit_bytes()),
    )(x2, w1, b1, w2, b2, gamma, beta)
    if rows_p != rows:
        out2 = out2[:rows]
    return out2.reshape(B, S, E)


# --------------------------------------------------- TransformerDecoderBlock

def init_params(key, embed_dim, num_heads, dim_feedforward):
    """Deterministic parameter init.  Linear weights stored as (in, out), f32."""
    ks = jax.random.split(key, 16)
    s = 0.02

    def lin(k, n_in, n_out):
        kw, kb = jax.random.split(k)
        w = s * jax.random.normal(kw, (n_in, n_out), jnp.float32)
        b = s * jax.random.normal(kb, (1, n_out), jnp.float32)
        return w, b

    p = {}
    for prefix, base in (("sa", 0), ("ca", 4)):
        for i, name in enumerate(("q", "k", "v", "o")):
            p[f"{prefix}_{name}_w"], p[f"{prefix}_{name}_b"] = lin(
                ks[base + i], embed_dim, embed_dim)
    p["ff_w1"], p["ff_b1"] = lin(ks[8], embed_dim, dim_feedforward)
    p["ff_w2"], p["ff_b2"] = lin(ks[9], embed_dim, dim_feedforward)[0].T * 0 + lin(ks[9], dim_feedforward, embed_dim)[0], lin(ks[9], dim_feedforward, embed_dim)[1]
    # (simpler, deterministic) recompute cleanly:
    p["ff_w2"], p["ff_b2"] = lin(ks[9], dim_feedforward, embed_dim)
    for i in (1, 2, 3):
        p[f"ln{i}_g"] = jnp.ones((1, embed_dim), jnp.float32)
        p[f"ln{i}_b"] = jnp.zeros((1, embed_dim), jnp.float32)
    return p


def prepare_decoder_params(params):
    """One-time host-side prep: bf16 MXU weights, fused (E, 2E) K|V projections."""
    f = {}
    for prefix in ("sa", "ca"):
        f[f"{prefix}_wq"] = params[f"{prefix}_q_w"].astype(jnp.bfloat16)
        f[f"{prefix}_bq"] = params[f"{prefix}_q_b"]
        f[f"{prefix}_wkv"] = jnp.concatenate(
            [params[f"{prefix}_k_w"], params[f"{prefix}_v_w"]], axis=1).astype(jnp.bfloat16)
        f[f"{prefix}_bkv"] = jnp.concatenate(
            [params[f"{prefix}_k_b"], params[f"{prefix}_v_b"]], axis=1)
        f[f"{prefix}_wo"] = params[f"{prefix}_o_w"].astype(jnp.bfloat16)
        f[f"{prefix}_bo"] = params[f"{prefix}_o_b"]
    f["ff_w1"] = params["ff_w1"].astype(jnp.bfloat16)
    f["ff_w2"] = params["ff_w2"].astype(jnp.bfloat16)
    for k in ("ff_b1", "ff_b2", "ln1_g", "ln1_b", "ln2_g", "ln2_b", "ln3_g", "ln3_b"):
        f[k] = params[k]
    return f


def transformer_decoder_block(p, tgt, enc_out, *, num_heads):
    """p = prepare_decoder_params(init_params(...)).  Masks == None; dropout = identity."""
    # self-attention + residual + norm1   (one fused flash-attention kernel)
    x = fused_mha_add_ln(tgt, tgt,
                         p["sa_wq"], p["sa_bq"], p["sa_wkv"], p["sa_bkv"],
                         p["sa_wo"], p["sa_bo"], p["ln1_g"], p["ln1_b"],
                         num_heads=num_heads)
    # cross-attention + residual + norm2  (one fused flash-attention kernel)
    x = fused_mha_add_ln(x, enc_out,
                         p["ca_wq"], p["ca_bq"], p["ca_wkv"], p["ca_bkv"],
                         p["ca_wo"], p["ca_bo"], p["ln2_g"], p["ln2_b"],
                         num_heads=num_heads)
    # feed-forward + residual + norm3     (one fused kernel)
    x = fused_ffn_add_ln(x, p["ff_w1"], p["ff_b1"], p["ff_w2"], p["ff_b2"],
                         p["ln3_g"], p["ln3_b"])
    return x


# ----------------------------------------------------------- pure-JAX reference

def _ref_mha(x_q, x_kv, wq, bq, wk, bk, wv, bv, wo, bo, num_heads):
    B, Sq, E = x_q.shape
    Sk = x_kv.shape[1]
    hd = E // num_heads
    q = (x_q @ wq + bq).reshape(B, Sq, num_heads, hd).transpose(0, 2, 1, 3)
    k = (x_kv @ wk + bk).reshape(B, Sk, num_heads, hd).transpose(0, 2, 1, 3)
    v = (x_kv @ wv + bv).reshape(B, Sk, num_heads, hd).transpose(0, 2, 1, 3)
    s = (q @ k.transpose(0, 1, 3, 2)) / jnp.sqrt(jnp.float32(hd))
    w = jax.nn.softmax(s, axis=-1)
    a = (w @ v).transpose(0, 2, 1, 3).reshape(B, Sq, E)
    return a @ wo + bo


def _ref_ln(x, g, b, eps=1e-5):
    mu = jnp.mean(x, axis=-1, keepdims=True)
    var = jnp.mean((x - mu) ** 2, axis=-1, keepdims=True)
    return (x - mu) / jnp.sqrt(var + eps) * g + b


def _ref_block(p, tgt, enc, num_heads):
    sa = _ref_mha(tgt, tgt, p["sa_q_w"], p["sa_q_b"], p["sa_k_w"], p["sa_k_b"],
                  p["sa_v_w"], p["sa_v_b"], p["sa_o_w"], p["sa_o_b"], num_heads)
    x = _ref_ln(tgt + sa, p["ln1_g"], p["ln1_b"])
    ca = _ref_mha(x, enc, p["ca_q_w"], p["ca_q_b"], p["ca_k_w"], p["ca_k_b"],
                  p["ca_v_w"], p["ca_v_b"], p["ca_o_w"], p["ca_o_b"], num_heads)
    x = _ref_ln(x + ca, p["ln2_g"], p["ln2_b"])
    ff = jnp.maximum(x @ p["ff_w1"] + p["ff_b1"], 0.0) @ p["ff_w2"] + p["ff_b2"]
    return _ref_ln(x + ff, p["ln3_g"], p["ln3_b"])


# ------------------------------------------------------------------ main

if __name__ == "__main__":
    B, S_TGT, S_ENC = 2, 8, 8
    EMBED_DIM, NUM_HEADS, DIM_FF = 32, 4, 64

    key = jax.random.PRNGKey(0)
    k_tgt, k_enc, k_par = jax.random.split(key, 3)
    tgt = jax.random.normal(k_tgt, (B, S_TGT, EMBED_DIM), jnp.float32)
    enc = jax.random.normal(k_enc, (B, S_ENC, EMBED_DIM), jnp.float32)

    params = init_params(k_par, EMBED_DIM, NUM_HEADS, DIM_FF)
    kparams = prepare_decoder_params(params)

    out = transformer_decoder_block(kparams, tgt, enc, num_heads=NUM_HEADS)
    out = jax.block_until_ready(out)

    ref = _ref_block(params, tgt, enc, NUM_HEADS)
    assert out.shape == (B, S_TGT, EMBED_DIM)
    # tolerance loosened vs the f32 reference: bf16 MXU operands + approx reciprocal
    assert jnp.max(jnp.abs(out - ref)) < 2e-2, "mismatch vs pure-JAX reference"

    print("KERNEL_OK")
</pallas_src>

<mosaic_0001>
module attributes {stable_mosaic.version = 11 : i64} {
  func.func @_mha_add_ln_kernel(%arg0: i32, %arg1: i32, %arg2: i32, %arg3: memref<1x8x32xf32, #tpu.memory_space<vmem>>, %arg4: memref<1x8x32xf32, #tpu.memory_space<vmem>>, %arg5: memref<32x32xbf16, #tpu.memory_space<vmem>>, %arg6: memref<1x32xf32, #tpu.memory_space<vmem>>, %arg7: memref<32x64xbf16, #tpu.memory_space<vmem>>, %arg8: memref<1x64xf32, #tpu.memory_space<vmem>>, %arg9: memref<32x32xbf16, #tpu.memory_space<vmem>>, %arg10: memref<1x32xf32, #tpu.memory_space<vmem>>, %arg11: memref<1x32xf32, #tpu.memory_space<vmem>>, %arg12: memref<1x32xf32, #tpu.memory_space<vmem>>, %arg13: memref<1x8x32xf32, #tpu.memory_space<vmem>>, %arg14: memref<8x4x8xbf16, #tpu.memory_space<vmem>>, %arg15: memref<4x8x1xf32, #tpu.memory_space<vmem>>, %arg16: memref<4x8x1xf32, #tpu.memory_space<vmem>>, %arg17: memref<4x8x8xf32, #tpu.memory_space<vmem>>) attributes {dimension_semantics = [#tpu.dimension_semantics<parallel>, #tpu.dimension_semantics<parallel>, #tpu.dimension_semantics<arbitrary>], iteration_bounds = array<i64: 2, 1, 1>, scalar_prefetch = 0 : i64, scratch_operands = 4 : i64, tpu.core_type = #tpu.core_type<tc>, window_params = [{transform_indices = @transform_0, window_bounds = array<i64: 1, 8, 32>}, {transform_indices = @transform_1, window_bounds = array<i64: 1, 8, 32>}, {pipeline_mode = #tpu.pipeline_mode<synchronous>, transform_indices = @transform_2, window_bounds = array<i64: 32, 32>}, {pipeline_mode = #tpu.pipeline_mode<synchronous>, transform_indices = @transform_3, window_bounds = array<i64: 1, 32>}, {pipeline_mode = #tpu.pipeline_mode<synchronous>, transform_indices = @transform_4, window_bounds = array<i64: 32, 64>}, {pipeline_mode = #tpu.pipeline_mode<synchronous>, transform_indices = @transform_5, window_bounds = array<i64: 1, 64>}, {pipeline_mode = #tpu.pipeline_mode<synchronous>, transform_indices = @transform_6, window_bounds = array<i64: 32, 32>}, {pipeline_mode = #tpu.pipeline_mode<synchronous>, transform_indices = @transform_7, window_bounds = array<i64: 1, 32>}, {pipeline_mode = #tpu.pipeline_mode<synchronous>, transform_indices = @transform_8, window_bounds = array<i64: 1, 32>}, {pipeline_mode = #tpu.pipeline_mode<synchronous>, transform_indices = @transform_9, window_bounds = array<i64: 1, 32>}, {transform_indices = @transform_10, window_bounds = array<i64: 1, 8, 32>}]} {
    %c0_i32 = arith.constant 0 : i32
    %0 = arith.cmpi eq, %arg2, %c0_i32 : i32
    %1 = arith.extui %0 : i1 to i32
    %c0_i32_0 = arith.constant 0 : i32
    %2 = arith.cmpi ne, %1, %c0_i32_0 : i32
    scf.if %2 {
      %c0_37 = arith.constant 0 : index
      %c0_38 = arith.constant 0 : index
      %c0_39 = arith.constant 0 : index
      %46 = vector.load %arg3[%c0_37, %c0_38, %c0_39] : memref<1x8x32xf32, #tpu.memory_space<vmem>>, vector<1x8x32xf32>
      %47 = vector.shape_cast %46 : vector<1x8x32xf32> to vector<8x32xf32>
      %48 = arith.truncf %47 : vector<8x32xf32> to vector<8x32xbf16>
      %c0_40 = arith.constant 0 : index
      %c0_41 = arith.constant 0 : index
      %49 = vector.load %arg5[%c0_40, %c0_41] : memref<32x32xbf16, #tpu.memory_space<vmem>>, vector<32x32xbf16>
      %cst_42 = arith.constant dense<0.000000e+00> : vector<8x32xf32>
      %50 = tpu.matmul %48, %49, %cst_42 {dimension_numbers = #tpu.dot_dimension_numbers<[1], [0], [0], [1], [0, 0, 1, 1], [], []>} : vector<8x32xbf16>, vector<32x32xbf16>, vector<8x32xf32> -> vector<8x32xf32>
      %c0_43 = arith.constant 0 : index
      %c0_44 = arith.constant 0 : index
      %51 = vector.load %arg6[%c0_43, %c0_44] : memref<1x32xf32, #tpu.memory_space<vmem>>, vector<1x32xf32>
      %52 = vector.broadcast %51 : vector<1x32xf32> to vector<8x32xf32>
      %53 = arith.addf %50, %52 : vector<8x32xf32>
      %cst_45 = arith.constant 0.353553385 : f32
      %54 = vector.broadcast %cst_45 : f32 to vector<8x32xf32>
      %55 = arith.mulf %53, %54 : vector<8x32xf32>
      %56 = vector.shape_cast %55 : vector<8x32xf32> to vector<8x4x8xf32>
      %57 = arith.truncf %56 : vector<8x4x8xf32> to vector<8x4x8xbf16>
      %c0_46 = arith.constant 0 : index
      %c0_47 = arith.constant 0 : index
      %c0_48 = arith.constant 0 : index
      %58 = vector.load %arg14[%c0_46, %c0_47, %c0_48] : memref<8x4x8xbf16, #tpu.memory_space<vmem>>, vector<8x4x8xbf16>
      tpu.vector_store %arg14[%c0_46, %c0_47, %c0_48], %57 {strides = array<i32>} : memref<8x4x8xbf16, #tpu.memory_space<vmem>>, vector<8x4x8xbf16>,
      %cst_49 = arith.constant 0xFF800000 : f32
      %59 = vector.broadcast %cst_49 : f32 to vector<4x8x1xf32>
      %c0_50 = arith.constant 0 : index
      %c0_51 = arith.constant 0 : index
      %c0_52 = arith.constant 0 : index
      %60 = vector.load %arg15[%c0_50, %c0_51, %c0_52] : memref<4x8x1xf32, #tpu.memory_space<vmem>>, vector<4x8x1xf32>
      tpu.vector_store %arg15[%c0_50, %c0_51, %c0_52], %59 {strides = array<i32>} : memref<4x8x1xf32, #tpu.memory_space<vmem>>, vector<4x8x1xf32>,
      %cst_53 = arith.constant 0.000000e+00 : f32
      %61 = vector.broadcast %cst_53 : f32 to vector<4x8x1xf32>
      %c0_54 = arith.constant 0 : index
      %c0_55 = arith.constant 0 : index
      %c0_56 = arith.constant 0 : index
      %62 = vector.load %arg16[%c0_54, %c0_55, %c0_56] : memref<4x8x1xf32, #tpu.memory_space<vmem>>, vector<4x8x1xf32>
      tpu.vector_store %arg16[%c0_54, %c0_55, %c0_56], %61 {strides = array<i32>} : memref<4x8x1xf32, #tpu.memory_space<vmem>>, vector<4x8x1xf32>,
      %cst_57 = arith.constant 0.000000e+00 : f32
      %63 = vector.broadcast %cst_57 : f32 to vector<4x8x8xf32>
      %c0_58 = arith.constant 0 : index
      %c0_59 = arith.constant 0 : index
      %c0_60 = arith.constant 0 : index
      %64 = vector.load %arg17[%c0_58, %c0_59, %c0_60] : memref<4x8x8xf32, #tpu.memory_space<vmem>>, vector<4x8x8xf32>
      tpu.vector_store %arg17[%c0_58, %c0_59, %c0_60], %63 {strides = array<i32>} : memref<4x8x8xf32, #tpu.memory_space<vmem>>, vector<4x8x8xf32>,
    } else {
    }
    %c0 = arith.constant 0 : index
    %c0_1 = arith.constant 0 : index
    %c0_2 = arith.constant 0 : index
    %3 = vector.load %arg4[%c0, %c0_1, %c0_2] : memref<1x8x32xf32, #tpu.memory_space<vmem>>, vector<1x8x32xf32>
    %4 = vector.shape_cast %3 : vector<1x8x32xf32> to vector<8x32xf32>
    %5 = arith.truncf %4 : vector<8x32xf32> to vector<8x32xbf16>
    %c0_3 = arith.constant 0 : index
    %c0_4 = arith.constant 0 : index
    %6 = vector.load %arg7[%c0_3, %c0_4] : memref<32x64xbf16, #tpu.memory_space<vmem>>, vector<32x64xbf16>
    %cst = arith.constant dense<0.000000e+00> : vector<8x64xf32>
    %7 = tpu.matmul %5, %6, %cst {dimension_numbers = #tpu.dot_dimension_numbers<[1], [0], [0], [1], [0, 0, 1, 1], [], []>} : vector<8x32xbf16>, vector<32x64xbf16>, vector<8x64xf32> -> vector<8x64xf32>
    %c0_5 = arith.constant 0 : index
    %c0_6 = arith.constant 0 : index
    %8 = vector.load %arg8[%c0_5, %c0_6] : memref<1x64xf32, #tpu.memory_space<vmem>>, vector<1x64xf32>
    %9 = vector.broadcast %8 : vector<1x64xf32> to vector<8x64xf32>
    %10 = arith.addf %7, %9 : vector<8x64xf32>
    %11 = vector.extract_strided_slice %10 {offsets = [0, 0], sizes = [8, 32], strides = [1, 1]} : vector<8x64xf32> to vector<8x32xf32>
    %12 = vector.shape_cast %11 : vector<8x32xf32> to vector<8x4x8xf32>
    %13 = arith.truncf %12 : vector<8x4x8xf32> to vector<8x4x8xbf16>
    %14 = vector.extract_strided_slice %10 {offsets = [0, 32], sizes = [8, 32], strides = [1, 1]} : vector<8x64xf32> to vector<8x32xf32>
    %15 = vector.shape_cast %14 : vector<8x32xf32> to vector<8x4x8xf32>
    %16 = arith.truncf %15 : vector<8x4x8xf32> to vector<8x4x8xbf16>
    %c0_7 = arith.constant 0 : index
    %c0_8 = arith.constant 0 : index
    %c0_9 = arith.constant 0 : index
    %17 = vector.load %arg14[%c0_7, %c0_8, %c0_9] : memref<8x4x8xbf16, #tpu.memory_space<vmem>>, vector<8x4x8xbf16>
    "tpu.trace_start"() <{level = 10 : i32, message = "qhd,khd->hqk"}> : () -> ()
    %cst_10 = arith.constant dense<0.000000e+00> : vector<4x8x8xf32>
    %18 = tpu.matmul %17, %13, %cst_10 {dimension_numbers = #tpu.dot_dimension_numbers<[2], [2], [0], [0], [0, 1, 0, 0, 1, 0], [1], [1]>} : vector<8x4x8xbf16>, vector<8x4x8xbf16>, vector<4x8x8xf32> -> vector<4x8x8xf32>
    "tpu.trace_stop"() : () -> ()
    %c0_11 = arith.constant 0 : index
    %c0_12 = arith.constant 0 : index
    %c0_13 = arith.constant 0 : index
    %19 = vector.load %arg15[%c0_11, %c0_12, %c0_13] : memref<4x8x1xf32, #tpu.memory_space<vmem>>, vector<4x8x1xf32>
    %cst_14 = arith.constant dense<0xFF800000> : vector<4x8xf32>
    %20 = vector.multi_reduction <maximumf>, %18, %cst_14 [2] : vector<4x8x8xf32> to vector<4x8xf32>
    %21 = vector.shape_cast %20 : vector<4x8xf32> to vector<4x8x1xf32>
    %22 = arith.maximumf %19, %21 : vector<4x8x1xf32>
    %c0_15 = arith.constant 0 : index
    %c0_16 = arith.constant 0 : index
    %c0_17 = arith.constant 0 : index
    %23 = vector.load %arg15[%c0_15, %c0_16, %c0_17] : memref<4x8x1xf32, #tpu.memory_space<vmem>>, vector<4x8x1xf32>
    %24 = arith.subf %23, %22 : vector<4x8x1xf32>
    %25 = math.exp %24 : vector<4x8x1xf32>
    %26 = vector.broadcast %22 : vector<4x8x1xf32> to vector<4x8x8xf32>
    %27 = arith.subf %18, %26 : vector<4x8x8xf32>
    %28 = math.exp %27 : vector<4x8x8xf32>
    %c0_18 = arith.constant 0 : index
    %c0_19 = arith.constant 0 : index
    %c0_20 = arith.constant 0 : index
    %29 = vector.load %arg16[%c0_18, %c0_19, %c0_20] : memref<4x8x1xf32, #tpu.memory_space<vmem>>, vector<4x8x1xf32>
    %30 = arith.mulf %25, %29 : vector<4x8x1xf32>
    %cst_21 = arith.constant dense<0.000000e+00> : vector<4x8xf32>
    %31 = vector.multi_reduction <add>, %28, %cst_21 [2] : vector<4x8x8xf32> to vector<4x8xf32>
    %32 = vector.shape_cast %31 : vector<4x8xf32> to vector<4x8x1xf32>
    %33 = arith.addf %30, %32 : vector<4x8x1xf32>
    %c0_22 = arith.constant 0 : index
    %c0_23 = arith.constant 0 : index
    %c0_24 = arith.constant 0 : index
    %34 = vector.load %arg16[%c0_22, %c0_23, %c0_24] : memref<4x8x1xf32, #tpu.memory_space<vmem>>, vector<4x8x1xf32>
    tpu.vector_store %arg16[%c0_22, %c0_23, %c0_24], %33 {strides = array<i32>} : memref<4x8x1xf32, #tpu.memory_space<vmem>>, vector<4x8x1xf32>,
    %c0_25 = arith.constant 0 : index
    %c0_26 = arith.constant 0 : index
    %c0_27 = arith.constant 0 : index
    %35 = vector.load %arg17[%c0_25, %c0_26, %c0_27] : memref<4x8x8xf32, #tpu.memory_space<vmem>>, vector<4x8x8xf32>
    %36 = vector.broadcast %25 : vector<4x8x1xf32> to vector<4x8x8xf32>
    %37 = arith.mulf %36, %35 : vector<4x8x8xf32>
    %38 = arith.truncf %28 : vector<4x8x8xf32> to vector<4x8x8xbf16>
    "tpu.trace_start"() <{level = 10 : i32, message = "hqk,khd->hqd"}> : () -> ()
    %cst_28 = arith.constant dense<0.000000e+00> : vector<4x8x8xf32>
    %39 = tpu.matmul %38, %16, %cst_28 {dimension_numbers = #tpu.dot_dimension_numbers<[2], [0], [1], [2], [0, 0, 0, 1, 1, 2], [0], [1]>} : vector<4x8x8xbf16>, vector<8x4x8xbf16>, vector<4x8x8xf32> -> vector<4x8x8xf32>
    "tpu.trace_stop"() : () -> ()
    %40 = arith.addf %37, %39 : vector<4x8x8xf32>
    %c0_29 = arith.constant 0 : index
    %c0_30 = arith.constant 0 : index
    %c0_31 = arith.constant 0 : index
    %41 = vector.load %arg17[%c0_29, %c0_30, %c0_31] : memref<4x8x8xf32, #tpu.memory_space<vmem>>, vector<4x8x8xf32>
    tpu.vector_store %arg17[%c0_29, %c0_30, %c0_31], %40 {strides = array<i32>} : memref<4x8x8xf32, #tpu.memory_space<vmem>>, vector<4x8x8xf32>,
    %c0_32 = arith.constant 0 : index
    %c0_33 = arith.constant 0 : index
    %c0_34 = arith.constant 0 : index
    %42 = vector.load %arg15[%c0_32, %c0_33, %c0_34] : memref<4x8x1xf32, #tpu.memory_space<vmem>>, vector<4x8x1xf32>
    tpu.vector_store %arg15[%c0_32, %c0_33, %c0_34], %22 {strides = array<i32>} : memref<4x8x1xf32, #tpu.memory_space<vmem>>, vector<4x8x1xf32>,
    %c0_i32_35 = arith.constant 0 : i32
    %43 = arith.cmpi eq, %arg2, %c0_i32_35 : i32
    %44 = arith.extui %43 : i1 to i32
    %c0_i32_36 = arith.constant 0 : i32
    %45 = arith.cmpi ne, %44, %c0_i32_36 : i32
    scf.if %45 {
      %c0_37 = arith.constant 0 : index
      %c0_38 = arith.constant 0 : index
      %c0_39 = arith.constant 0 : index
      %46 = vector.load %arg17[%c0_37, %c0_38, %c0_39] : memref<4x8x8xf32, #tpu.memory_space<vmem>>, vector<4x8x8xf32>
      %c0_40 = arith.constant 0 : index
      %c0_41 = arith.constant 0 : index
      %c0_42 = arith.constant 0 : index
      %47 = vector.load %arg16[%c0_40, %c0_41, %c0_42] : memref<4x8x1xf32, #tpu.memory_space<vmem>>, vector<4x8x1xf32>
      %48 = tpu.reciprocal %47 {approx = true} : vector<4x8x1xf32> -> vector<4x8x1xf32>
      %49 = vector.broadcast %48 : vector<4x8x1xf32> to vector<4x8x8xf32>
      %50 = arith.mulf %46, %49 : vector<4x8x8xf32>
      %51 = tpu.transpose %50, [1, 0, 2] : vector<4x8x8xf32> -> vector<8x4x8xf32>
      %52 = vector.shape_cast %51 : vector<8x4x8xf32> to vector<8x32xf32>
      %53 = arith.truncf %52 : vector<8x32xf32> to vector<8x32xbf16>
      %c0_43 = arith.constant 0 : index
      %c0_44 = arith.constant 0 : index
      %54 = vector.load %arg9[%c0_43, %c0_44] : memref<32x32xbf16, #tpu.memory_space<vmem>>, vector<32x32xbf16>
      %cst_45 = arith.constant dense<0.000000e+00> : vector<8x32xf32>
      %55 = tpu.matmul %53, %54, %cst_45 {dimension_numbers = #tpu.dot_dimension_numbers<[1], [0], [0], [1], [0, 0, 1, 1], [], []>} : vector<8x32xbf16>, vector<32x32xbf16>, vector<8x32xf32> -> vector<8x32xf32>
      %c0_46 = arith.constant 0 : index
      %c0_47 = arith.constant 0 : index
      %56 = vector.load %arg10[%c0_46, %c0_47] : memref<1x32xf32, #tpu.memory_space<vmem>>, vector<1x32xf32>
      %57 = vector.broadcast %56 : vector<1x32xf32> to vector<8x32xf32>
      %58 = arith.addf %55, %57 : vector<8x32xf32>
      %c0_48 = arith.constant 0 : index
      %c0_49 = arith.constant 0 : index
      %c0_50 = arith.constant 0 : index
      %59 = vector.load %arg3[%c0_48, %c0_49, %c0_50] : memref<1x8x32xf32, #tpu.memory_space<vmem>>, vector<1x8x32xf32>
      %60 = vector.shape_cast %59 : vector<1x8x32xf32> to vector<8x32xf32>
      %61 = arith.addf %60, %58 : vector<8x32xf32>
      %cst_51 = arith.constant dense<0.000000e+00> : vector<8xf32>
      %62 = vector.multi_reduction <add>, %61, %cst_51 [1] : vector<8x32xf32> to vector<8xf32>
      %63 = vector.shape_cast %62 : vector<8xf32> to vector<8x1xf32>
      %cst_52 = arith.constant 3.200000e+01 : f32
      %64 = vector.broadcast %cst_52 : f32 to vector<8x1xf32>
      %65 = arith.divf %63, %64 : vector<8x1xf32>
      %66 = vector.broadcast %65 : vector<8x1xf32> to vector<8x32xf32>
      %67 = arith.subf %61, %66 : vector<8x32xf32>
      %68 = vector.broadcast %65 : vector<8x1xf32> to vector<8x32xf32>
      %69 = arith.subf %61, %68 : vector<8x32xf32>
      %70 = arith.mulf %67, %69 : vector<8x32xf32>
      %cst_53 = arith.constant dense<0.000000e+00> : vector<8xf32>
      %71 = vector.multi_reduction <add>, %70, %cst_53 [1] : vector<8x32xf32> to vector<8xf32>
      %72 = vector.shape_cast %71 : vector<8xf32> to vector<8x1xf32>
      %cst_54 = arith.constant 3.200000e+01 : f32
      %73 = vector.broadcast %cst_54 : f32 to vector<8x1xf32>
      %74 = arith.divf %72, %73 : vector<8x1xf32>
      %75 = vector.broadcast %65 : vector<8x1xf32> to vector<8x32xf32>
      %76 = arith.subf %61, %75 : vector<8x32xf32>
      %cst_55 = arith.constant 9.99999974E-6 : f32
      %77 = vector.broadcast %cst_55 : f32 to vector<8x1xf32>
      %78 = arith.addf %74, %77 : vector<8x1xf32>
      %79 = math.rsqrt %78 : vector<8x1xf32>
      %80 = vector.broadcast %79 : vector<8x1xf32> to vector<8x32xf32>
      %81 = arith.mulf %76, %80 : vector<8x32xf32>
      %c0_56 = arith.constant 0 : index
      %c0_57 = arith.constant 0 : index
      %82 = vector.load %arg11[%c0_56, %c0_57] : memref<1x32xf32, #tpu.memory_space<vmem>>, vector<1x32xf32>
      %83 = vector.broadcast %82 : vector<1x32xf32> to vector<8x32xf32>
      %84 = arith.mulf %81, %83 : vector<8x32xf32>
      %c0_58 = arith.constant 0 : index
      %c0_59 = arith.constant 0 : index
      %85 = vector.load %arg12[%c0_58, %c0_59] : memref<1x32xf32, #tpu.memory_space<vmem>>, vector<1x32xf32>
      %86 = vector.broadcast %85 : vector<1x32xf32> to vector<8x32xf32>
      %87 = arith.addf %84, %86 : vector<8x32xf32>
      %c0_60 = arith.constant 0 : index
      %c0_61 = arith.constant 0 : index
      %c0_62 = arith.constant 0 : index
      %88 = vector.load %arg13[%c0_60, %c0_61, %c0_62] : memref<1x8x32xf32, #tpu.memory_space<vmem>>, vector<1x8x32xf32>
      %89 = vector.shape_cast %88 : vector<1x8x32xf32> to vector<8x32xf32>
      %90 = vector.shape_cast %87 : vector<8x32xf32> to vector<1x8x32xf32>
      tpu.vector_store %arg13[%c0_60, %c0_61, %c0_62], %90 {strides = array<i32>} : memref<1x8x32xf32, #tpu.memory_space<vmem>>, vector<1x8x32xf32>,
    } else {
    }
    return
  }
  func.func @transform_0(%arg0: i32, %arg1: i32, %arg2: i32) -> (i32, i32, i32) {
    %c0_i32 = arith.constant 0 : i32
    %c0_i32_0 = arith.constant 0 : i32
    return %arg0, %arg1, %c0_i32 : i32, i32, i32
  }
  func.func @transform_1(%arg0: i32, %arg1: i32, %arg2: i32) -> (i32, i32, i32) {
    %c0_i32 = arith.constant 0 : i32
    %c0_i32_0 = arith.constant 0 : i32
    return %arg0, %arg2, %c0_i32 : i32, i32, i32
  }
  func.func @transform_2(%arg0: i32, %arg1: i32, %arg2: i32) -> (i32, i32) {
    %c0_i32 = arith.constant 0 : i32
    %c0_i32_0 = arith.constant 0 : i32
    %c0_i32_1 = arith.constant 0 : i32
    return %c0_i32, %c0_i32_0 : i32, i32
  }
  func.func @transform_3(%arg0: i32, %arg1: i32, %arg2: i32) -> (i32, i32) {
    %c0_i32 = arith.constant 0 : i32
    %c0_i32_0 = arith.constant 0 : i32
    %c0_i32_1 = arith.constant 0 : i32
    return %c0_i32, %c0_i32_0 : i32, i32
  }
  func.func @transform_4(%arg0: i32, %arg1: i32, %arg2: i32) -> (i32, i32) {
    %c0_i32 = arith.constant 0 : i32
    %c0_i32_0 = arith.constant 0 : i32
    %c0_i32_1 = arith.constant 0 : i32
    return %c0_i32, %c0_i32_0 : i32, i32
  }
  func.func @transform_5(%arg0: i32, %arg1: i32, %arg2: i32) -> (i32, i32) {
    %c0_i32 = arith.constant 0 : i32
    %c0_i32_0 = arith.constant 0 : i32
    %c0_i32_1 = arith.constant 0 : i32
    return %c0_i32, %c0_i32_0 : i32, i32
  }
  func.func @transform_6(%arg0: i32, %arg1: i32, %arg2: i32) -> (i32, i32) {
    %c0_i32 = arith.constant 0 : i32
    %c0_i32_0 = arith.constant 0 : i32
    %c0_i32_1 = arith.constant 0 : i32
    return %c0_i32, %c0_i32_0 : i32, i32
  }
  func.func @transform_7(%arg0: i32, %arg1: i32, %arg2: i32) -> (i32, i32) {
    %c0_i32 = arith.constant 0 : i32
    %c0_i32_0 = arith.constant 0 : i32
    %c0_i32_1 = arith.constant 0 : i32
    return %c0_i32, %c0_i32_0 : i32, i32
  }
  func.func @transform_8(%arg0: i32, %arg1: i32, %arg2: i32) -> (i32, i32) {
    %c0_i32 = arith.constant 0 : i32
    %c0_i32_0 = arith.constant 0 : i32
    %c0_i32_1 = arith.constant 0 : i32
    return %c0_i32, %c0_i32_0 : i32, i32
  }
  func.func @transform_9(%arg0: i32, %arg1: i32, %arg2: i32) -> (i32, i32) {
    %c0_i32 = arith.constant 0 : i32
    %c0_i32_0 = arith.constant 0 : i32
    %c0_i32_1 = arith.constant 0 : i32
    return %c0_i32, %c0_i32_0 : i32, i32
  }
  func.func @transform_10(%arg0: i32, %arg1: i32, %arg2: i32) -> (i32, i32, i32) {
    %c0_i32 = arith.constant 0 : i32
    %c0_i32_0 = arith.constant 0 : i32
    return %arg0, %arg1, %c0_i32 : i32, i32, i32
  }
}

</mosaic_0001>

<bundles_post_ra>
// kernel: tpu_custom_call.1
= control target key start
LH: loop header
LB: loop body
LE: loop exit
PB: predicated region body
PF: predicated region fallthrough
CT: control target
= control target key end

     0   :  { %s3148_s0 = inlined_call_operand.hbm [shape: f32[2,8,32], index: 0, kind: input, shape index: {}]   ;;  %s3149_s1 = inlined_call_operand.hbm [shape: f32[2,8,32], index: 1, kind: input, shape index: {}]   ;;  %s3150_s2 = inlined_call_operand.hbm [shape: bf16[32,32], index: 2, kind: input, shape index: {}]   ;;  %s3151_s3 = inlined_call_operand.vmem [shape: f32[1,32], index: 3, kind: input, shape index: {}]   ;;  %s3152_s4 = inlined_call_operand.hbm [shape: bf16[32,64], index: 4, kind: input, shape index: {}]   ;;  %s3153_s5 = inlined_call_operand.vmem [shape: f32[1,64], index: 5, kind: input, shape index: {}]   ;;  %s3154_s6 = inlined_call_operand.hbm [shape: bf16[32,32], index: 6, kind: input, shape index: {}]   ;;  %s3155_s7 = inlined_call_operand.vmem [shape: f32[1,32], index: 7, kind: input, shape index: {}]   ;;  %s3156_s8 = inlined_call_operand.vmem [shape: f32[1,32], index: 8, kind: input, shape index: {}]   ;;  %s3157_s9 = inlined_call_operand.vmem [shape: f32[1,32], index: 9, kind: input, shape index: {}]   ;;  %s3158_s10 = inlined_call_operand.hbm [shape: f32[2,8,32], index: 10, kind: output, shape index: {}]  }
   0x1   :  { %3166 = sst [smem:[#allocation28_spill]] %s3150_s2 }
   0x2   :  { %3167 = sst [smem:[#allocation29_spill]] %s3152_s4 }
   0x3   :  { %3168 = sst [smem:[#allocation30_spill]] %s3154_s6 }
   0x4   :  { %3169 = sst [smem:[#allocation31_spill]] %s3157_s9 }
   0x5   :  { %15 = vsyncpa [#allocation7], 0 }
   0x6   :  { %17 = vsyncpa [#allocation7 + $0x1], 0 }
   0x7   :  { %18 = vsyncpa [#allocation10], 0 }
   0x8   :  { %20 = vsyncpa [#allocation10 + $0x1], 0 }
   0x9   :  { %21 = vsyncpa [#allocation13], 0 }
   0xa   :  { %22 = vsyncpa [#allocation8], 0 }
   0xb   :  { %24 = vsyncpa [#allocation8 + $0x1], 0  ;;  %s2626_s13 = smov 0   ;;  %s2628_s14 = smov 0  }
   0xc   :  { %s2630_s15 = smov 0   ;;  %s2632_s16 = smov 0  }
   0xd   :  { %s2634_s17 = smov 0   ;;  %s2636_s18 = smov 0  }
   0xe LB: > { %3170 = sst [smem:[#allocation21_spill]] %s2531_s13  ;;  %s2657_s19 = sadd.s32 4294967295, %s2551_s18   ;;  %s2551_s18 = sphi %s2636_s18, %s30_s18   ;;  %s2547_s17 = sphi %s2634_s17, %s3193_s17   ;;  %s2543_s16 = sphi %s2632_s16, %s3192_s16   ;;  %s2539_s15 = sphi %s2630_s15, %s3191_s15   ;;  %s2535_s14 = sphi %s2628_s14, %s3195_s14   ;;  %s2531_s13 = sphi %s2626_s13, %s3194_s13  }
   0xf   : > { %3171 = sst [smem:[#allocation22_spill]] %s2539_s15  ;;  %p2048_p0 = scmp.ge.s32.totalorder %s2551_s18, 1 }
  0x10   : > { %3172 = sst [smem:[#allocation23_spill]] %s2547_s17  ;;  %p72_p1 = scmp.eq.s32.totalorder %s2657_s19, 0 }
  0x11   : > { %p306_p2 = scmp.lt.s32.totalorder %s2551_s18, 3  ;;  %s3173_s2 = sld [smem:[#allocation28_spill]] }
  0x12   : > { %s2553_s24 = smov [#allocation11]   ;;  %p2052_p6 = scmp.ge.s32.totalorder %s2551_s18, 2 }
  0x13   : > { %p2665_p3 = pnand %p2048_p0, %p306_p2  ;;  %s319_s25 = sshll.u32 %s2553_s24, 4  ;;  %s320_s25 = int_to_ptr.vmem [resolvable:$true] %s319_s25 }
  0x14   : > { %s3176_s4 = sld [smem:[#allocation29_spill]]  ;;  %s2554_s30 = smov 64  }
  0x15   : > { %p2127_p4 = pneg %p2665_p3  ;;  %s2555_s11 = smov 4  }
  0x16   : > { %s2556_s12 = smov [#allocation12]   ;;  %s3177_s6 = sld [smem:[#allocation30_spill]] }
  0x17   : > { %s317_s22 = sshll.u32 %s3173_s2, 4  ;;  %p2673_p5 = pnand %p2127_p4, %p72_p1  ;;  %s318_s22 = int_to_ptr.hbm [resolvable:$true] %s317_s22 }
  0x18   : > { %s336_s20 = sshll.u32 %s2556_s12, 4  ;;  %s2557_s28 = smov [#allocation14]   ;;  %s337_s20 = int_to_ptr.vmem [resolvable:$true] %s336_s20 }
  0x19   : > { %2130 = dma.hbm_to_vmem [thread:$0]  (!%p2673_p5), %s318_s22, 256, %s320_s25, [#allocation10], %s2554_s30, %s2554_s30, %s2555_s11  }
  0x1a   : > { %s334_s29 = sshll.u32 %s3176_s4, 4  ;;  %s353_s2 = sshll.u32 %s2557_s28, 4  ;;  %s335_s29 = int_to_ptr.hbm [resolvable:$true] %s334_s29  ;;  %s354_s2 = int_to_ptr.vmem [resolvable:$true] %s353_s2 }
  0x1b   : > { %2133 = dma.hbm_to_vmem [thread:$0]  (!%p2673_p5), %s335_s29, 256, %s337_s20, [#allocation13], %s2554_s30, %s2554_s30, %s2555_s11  }
  0x1c   : > { %s351_s27 = sshll.u32 %s3177_s6, 4  ;;  %s2047_s22 = sadd.s32 4294967294, %s2551_s18   ;;  %s352_s27 = int_to_ptr.hbm [resolvable:$true] %s351_s27 }
  0x1d   : > { %2136 = dma.hbm_to_vmem [thread:$0]  (!%p2673_p5), %s352_s27, 256, %s354_s2, [#allocation13], %s2554_s30, %s2554_s30, %s2555_s11  }
  0x1e   : > { %s49_s25 = sadd.s32 1, %s2547_s17  ;;  %s58_s12 = sadd.s32 1, %s2539_s15 }
  0x1f   : > { %p51_p7 = scmp.ge.s32.totalorder %s49_s25, 2  ;;  %p65_p8 = scmp.ne.s32.totalorder %s2539_s15, %s2535_s14 }
  0x20   : > { %p66_p9 = scmp.eq.s32.totalorder %s2551_s18, 0  ;;  %p71_p10 = scmp.ne.s32.totalorder %s2535_s14, %s2531_s13 }
  0x21   : > { %s3197_s25 = smov (%p51_p7, %s49_s25), 0  ;;  %p293_p13 = scmp.eq.s32.totalorder %s2657_s19, 1 }
  0x22   : > { %3178 = sst [smem:[#allocation24_spill]] %s3197_s25  ;;  %p2700_p11 = por %p66_p9, %p65_p8 }
  0x23   : > { %p2706_p12 = por %p72_p1, %p71_p10  ;;  %s53_s26 = ssub.s32 %s2547_s17, %s3197_s25 }
  0x24   : > { %p56_p0 = scmp.eq.s32.totalorder %s53_s26, 0  ;;  %p299_p2 = scmp.eq.s32.totalorder %s2047_s22, 1 }
  0x25   : > { %p2713_p4 = por %p293_p13, %p65_p8  ;;  %p2151_p5 = scmp.lt.s32.totalorder %s2551_s18, 2 }
  0x26   : > { %s2719_s11 = scalar_select %p56_p0, %s2539_s15, %s58_s12  }
  0x27   : > { %s3181_s30 = scalar_select %p2713_p4, 1, 0 }
  0x28   : > { %3183 = sst [smem:[#allocation26_spill]] %s2719_s11  ;;  %p2721_p7 = por %p299_p2, %p71_p10 }
  0x29   : > { %3182 = sst [smem:[#allocation25_spill]] %s3181_s30  ;;  %s376_s21 = sand.u32 1, %s2539_s15  }
  0x2a   : > { %s3184_s20 = scalar_select %p2721_p7, 1, 0 }
  0x2b   : > { %s2053_s24 = sshll.u32 %s376_s21, 3  ;;  %s2054_s27 = sshll.u32 %s2547_s17, 3 }
  0x2c   : > { %3185 = sst [smem:[#allocation27_spill]] %s3184_s20  ;;  %s385_s26 = scalar_lea.hbm %s3148_s0, %s2054_s27 }
  0x2d   : > { %s380_s22 = scalar_lea.vmem [#allocation6], %s2053_s24  ;;  %s387_s25 = sshll.u32 %s385_s26, 4  ;;  %s388_s25 = int_to_ptr.hbm [resolvable:$true] %s387_s25 }
  0x2e   : > { %s389_s6 = sshll.u32 %s380_s22, 4  ;;  %p2138_p8 = pnand %p2151_p5, %p2700_p11  ;;  %s390_s6 = int_to_ptr.vmem [resolvable:$true] %s389_s6 }
  0x2f   : > { %s405_s13 = scalar_lea.hbm %s3149_s1, %s2054_s27  ;;  %s396_s9 = sand.u32 1, %s2551_s18  }
  0x30   : > { %s377_s20 = scalar_lea.sflag [#allocation7], %s376_s21  ;;  %s407_s15 = sshll.u32 %s405_s13, 4  ;;  %s408_s15 = int_to_ptr.hbm [resolvable:$true] %s407_s15 }
  0x31   : > { %2140 = dma.hbm_to_vmem [thread:$0]  (!%p2138_p8), %s388_s25, 128, %s390_s6, %s377_s20  }
  0x32   : > { %s400_s17 = scalar_lea.vmem [#allocation9], %s2053_s24  ;;  %s397_s4 = scalar_lea.sflag [#allocation10], %s396_s9 }
  0x33   : > { %s409_s30 = sshll.u32 %s400_s17, 4  ;;  %418 = sbr.rel (%p2665_p3) target bundleno = 1958 (0x7a6), region = 60  ;;  %s410_s30 = int_to_ptr.vmem [resolvable:$true] %s409_s30 }
  0x34   : > { %2143 = dma.hbm_to_vmem [thread:$0]  (!%p2138_p8), %s408_s15, 128, %s410_s30, %s397_s4  }
  0x35   : > { %s2739_s29 = sand.u32 (!%p2665_p3), 1, %s2535_s14  }
  0x36   : > { %s2742_s11 = sshll.u32 (!%p2665_p3), %s2739_s29, 3  ;;  %s421_s6 = scalar_lea.sflag (!%p2665_p3), [#allocation7], %s2739_s29 }
  0x37   : > { %s424_s13 = scalar_lea.vmem (!%p2665_p3), [#allocation6], %s2742_s11 }
  0x38   : > { %2510 = dma.done.wait (%p2706_p12), %s421_s6, 128  }
  0x39   : > { %2512 = vsyncadd (%p2706_p12), %s421_s6, 4294967168  ;;  %s430_s9 = sand.u32 1, %s2657_s19   ;;  %s434_s17 = scalar_lea.vmem [#allocation9], %s2742_s11 }
  0x3a   : > { %s431_s15 = scalar_lea.sflag [#allocation10], %s430_s9 }
  0x3b   : > { %2514 = dma.done.wait (%p2706_p12), %s431_s15, 128  }
  0x3c   : > { %2516 = vsyncadd (%p2706_p12), %s431_s15, 4294967168 }
  0x3d   : > { %2518 = dma.done.wait (%p72_p1), [#allocation10], 256  }
  0x3e   : > { %2520 = vsyncadd (%p72_p1), [#allocation10], 4294967040 }
  0x3f   : > { %2522 = dma.done.wait (%p72_p1), [#allocation13], 512  }
  0x40   : > { %2524 = vsyncadd (%p72_p1), [#allocation13], 4294966784  ;;  %v2104_v0 = vld [vmem:[#allocation11 + $0x8] sm:$0xff]  ;;  %v2106_v1 = vld [vmem:[#allocation12 + $0x8] sm:$0xff]  ;;  %vm519_vm0 = vcmask 261120   ;;  %s2558_s30 = smov 112  }
  0x41   : > { %v2103_v2 = vld [vmem:[#allocation11] sm:$0xff]  ;;  %v2105_v3 = vld [vmem:[#allocation12] sm:$0xff]  ;;  %529 = vmatpush.bf16.msra.mxu0 %v2104_v0  ;;  %667 = vmatpush.bf16.msra.mxu1 %v2106_v1  ;;  %v2274_v8 = vld [vmem:[%s3151_s3] ss:$0 sm:$0xff]  ;;  %s2559_s20 = smov 120   ;;  %s2560_s21 = smov 104  }
  0x42   : > { %v497_v4 = vld [vmem:[%s424_s13] sm:$0xff]  ;;  %v635_v5 = vld [vmem:[%s434_s17] sm:$0xff]  ;;  %v2561_v18 = vmov 1983009808   ;;  %vm548_vm1 = vcmask 1047556   ;;  %vm612_vm2 = vcmask 58368  }
  0x43   : > { %v498_v6 = vpack.c.bf16 %v497_v4, %v497_v4  ;;  %v636_v7 = vpack.c.bf16 %v635_v5, %v635_v5  ;;  %v2275_v9 = vld [vmem:[%s3153_s5] ss:$0 sm:$0xff]  ;;  %v553_v19 = vunpack.c.l.s4 %v2561_v18  ;;  %v2562_v33 = vmov 1934713408   ;;  %s2563_s24 = smov 96   ;;  %s2567_s27 = smov 24  }
  0x44   : > { %v577_v34 = vunpack.c.l.s4 %v2562_v33  ;;  %vm1295_vm3 = vcmask 1043456   ;;  %vm630_vm4 = vcmask 64512   ;;  %vm621_vm5 = vcmask 7168   ;;  %s2568_s28 = smov 16   ;;  %s2569_s26 = smov 8  }
  0x45   : > { %530 = vmatpush.bf16.msra.mxu0 %v2103_v2  ;;  %668 = vmatpush.bf16.msra.mxu1 %v2105_v3  ;;  %v2780_v27 = vunpack.c.0.s8 %v553_v19  ;;  %vm1811_vm6 = vcmask 130048   ;;  %vm1813_vm7 = vcmask 195584   ;;  %s2100_s4 = sshll.u32 %s2543_s16, 3  ;;  %s3187_s2 = sld [smem:[#allocation31_spill]] }
  0x46   : > { %v2797_v45 = vunpack.c.0.s8 %v577_v34  ;;  %s1906_s17 = scalar_lea.hbm %s3158_s10, %s2100_s4  ;;  %s491_s16 = scalar_lea.vmem [#allocation15], %s2742_s11 }
  0x47   : > { %s2477_s11 = scalar_lea.hbm %s3158_s10, 16 }
  0x48   : > { %2072 = vmatmul.msk.bf16.vlgmr.msra.gmra.mxu0 %vm519_vm0, %v498_v6  ;;  %2081 = vmatmul.msk.bf16.vlgmr.msra.gmra.mxu1 %vm519_vm0, %v636_v7 }
  0xc5   : > { %v532_v10 = vpop.f32.mrf.mxu0  ;;  %v670_v11 = vpop.f32.mrf.mxu1 }
  0xc6   : > { %v533_v12 = vadd.f32 %v2274_v8, %v532_v10  ;;  %v2774_v13 = vadd.f32 %v2275_v9, %v670_v11 }
  0xc8   : > { %v536_v14 = vmul.f32 0.35355338, %v533_v12  ;;  %v687_v24 = vrot.slane %v2774_v13, 4 }
  0xca   : > { %v2232_v15 = vpack.i.bf16 %v536_v14, %v2774_v13  ;;  %v550_v26 = vrot.slane %v536_v14, 4 }
  0xcc   : > { %2233 = vrot.lane.b32.xlu1 %v2232_v15, %s2558_s30  ;;  %2223 = vrot.lane.b32.xlu0 %v2232_v15, %s2559_s20  ;;  %s1908_s30 = sshll.u32 %s491_s16, 4  ;;  %s1910_s20 = sshll.u32 %s1906_s17, 4  ;;  %s1909_s30 = int_to_ptr.vmem [resolvable:$true] %s1908_s30  ;;  %s1911_s20 = int_to_ptr.hbm [resolvable:$true] %s1910_s20 }
  0xcd   : > { %v534_v16 = vpop.f32.mrf.mxu0  ;;  %v672_v17 = vpop.f32.mrf.mxu1 }
  0xd4   : > { %2228 = vrot.lane.b32.xlu0 %v2232_v15, %s2560_s21  ;;  %s1895_s21 = scalar_lea.sflag [#allocation8], %s2739_s29 }
 0x13e   : > { %v2234_v20 = vpop.permute.xlu1 %2233  ;;  %v2224_v21 = vpop.permute.xlu0 %2223 }
 0x13f   : > { %v2236_v22 = vunpack.i.h.bf16 %v2234_v20  ;;  %v2777_v23 = vunpack.i.l.bf16 %v2234_v20  ;;  %v2226_v30 = vunpack.i.h.bf16 %v2224_v21  ;;  %v2785_v31 = vunpack.i.l.bf16 %v2224_v21 }
 0x141   : > { %v547_v25 = vrot.slane %v2236_v22, 4  ;;  %v551_v28 = vsel %vm548_vm1, %v2236_v22, %v550_v26  ;;  %v688_v29 = vsel %vm548_vm1, %v2777_v23, %v687_v24  ;;  %v684_v32 = vrot.slane %v2777_v23, 4 }
 0x142   : > { %v559_v36 = vperm.slane %v551_v28, %v2780_v27  ;;  %v696_v37 = vperm.slane %v688_v29, %v2780_v27  ;;  %v562_v39 = vrot.slane %v2226_v30, 4  ;;  %v699_v40 = vrot.slane %v2785_v31, 4 }
 0x143   : > { %v549_v35 = vsel %vm548_vm1, %v547_v25, %v536_v14  ;;  %v686_v44 = vsel %vm548_vm1, %v684_v32, %v2774_v13 }
 0x144   : > { %v555_v43 = vperm.slane %v549_v35, %v2780_v27  ;;  %v586_v50 = vrot.slane %v559_v36, 4  ;;  %v692_v54 = vperm.slane %v686_v44, %v2780_v27  ;;  %v723_v56 = vrot.slane %v696_v37, 4 }
 0x146   : > { %v2229_v38 = vpop.permute.xlu0 %2228  ;;  %v574_v57 = vrot.slane %v555_v43, 4  ;;  %v711_v12 = vrot.slane %v692_v54, 4 }
 0x147   : > { %v2231_v41 = vunpack.i.h.bf16 %v2229_v38  ;;  %v2792_v42 = vunpack.i.l.bf16 %v2229_v38 }
 0x149   : > { %v560_v46 = vrot.slane %v2231_v41, 4  ;;  %v563_v47 = vsel %vm548_vm1, %v2231_v41, %v562_v39  ;;  %v697_v48 = vrot.slane %v2792_v42, 4  ;;  %v700_v49 = vsel %vm548_vm1, %v2792_v42, %v699_v40 }
 0x14a   : > { %v571_v51 = vperm.slane %v563_v47, %v2780_v27  ;;  %v708_v52 = vperm.slane %v700_v49, %v2780_v27  ;;  %v2266_v53 = vpack.i.bf16 %v2792_v42, %v2777_v23 }
 0x14b   : > { %v561_v55 = vsel %vm548_vm1, %v560_v46, %v2226_v30  ;;  %v698_v62 = vsel %vm548_vm1, %v697_v48, %v2785_v31 }
 0x14c   : > { %v567_v58 = vperm.slane %v561_v55, %v2780_v27  ;;  %v584_v59 = vrot.slane %v571_v51, 4  ;;  %v587_v60 = vsel %vm548_vm1, %v571_v51, %v586_v50  ;;  %v721_v63 = vrot.slane %v708_v52, 4 }
 0x14d   : > { %v595_v61 = vperm.slane %v587_v60, %v2797_v45  ;;  %v724_v0 = vsel %vm548_vm1, %v708_v52, %v723_v56  ;;  %v704_v11 = vperm.slane %v698_v62, %v2780_v27 }
 0x14e   : > { %v572_v1 = vrot.slane %v567_v58, 4  ;;  %v575_v2 = vsel %vm548_vm1, %v567_v58, %v574_v57  ;;  %v585_v3 = vsel %vm548_vm1, %v584_v59, %v559_v36  ;;  %v732_v4 = vperm.slane %v724_v0, %v2797_v45 }
 0x14f   : > { %v583_v5 = vperm.slane %v575_v2, %v2797_v45  ;;  %v591_v6 = vperm.slane %v585_v3, %v2797_v45  ;;  %v602_v7 = vrot.slane %v595_v61, 4  ;;  %v610_v8 = vpack.c.bf16 %v595_v61, %v595_v61 }
 0x150   : > { %v573_v9 = vsel %vm548_vm1, %v572_v1, %v555_v43  ;;  %v739_v10 = vrot.slane %v732_v4, 4  ;;  %v722_v17 = vsel %vm548_vm1, %v721_v63, %v696_v37  ;;  %v747_v29 = vpack.c.bf16 %v732_v4, %v732_v4 }
 0x151   : > { %v579_v14 = vperm.slane %v573_v9, %v2797_v45  ;;  %v598_v15 = vrot.slane %v583_v5, 4  ;;  %v600_v16 = vrot.slane %v591_v6, 4  ;;  %619 = vst.msk [vmem:[#allocation2 + $0xc] sm:$0x3] %vm612_vm2, %v610_v8  ;;  %v603_v18 = vsel %vm548_vm1, 0.0, %v602_v7 }
 0x152   : > { %v606_v19 = vpack.c.bf16 %v583_v5, %v583_v5  ;;  %v608_v20 = vpack.c.bf16 %v591_v6, %v591_v6  ;;  %v740_v21 = vsel %vm548_vm1, 0.0, %v739_v10  ;;  %v728_v32 = vperm.slane %v722_v17, %v2797_v45 }
 0x153   : > { %v596_v22 = vrot.slane %v579_v14, 4  ;;  %v599_v24 = vsel %vm548_vm1, 0.0, %v598_v15  ;;  %v601_v25 = vsel %vm548_vm1, 0.0, %v600_v16  ;;  %v604_v26 = vpack.c.bf16 %v579_v14, %v579_v14 }
 0x154   : > { %v607_v28 = vpack.c.bf16 %v599_v24, %v599_v24  ;;  %615 = vst.msk [vmem:[#allocation2 + $0x4] sm:$0x3] %vm612_vm2, %v606_v19  ;;  %v748_v30 = vpack.c.bf16 %v740_v21, %v740_v21  ;;  %v609_v34 = vpack.c.bf16 %v601_v25, %v601_v25  ;;  %v712_v35 = vsel %vm548_vm1, %v704_v11, %v711_v12 }
 0x155   : > { %v597_v33 = vsel %vm548_vm1, 0.0, %v596_v22  ;;  %613 = vst.msk [vmem:[#allocation2] sm:$0x3] %vm612_vm2, %v604_v26  ;;  %v709_v36 = vrot.slane %v704_v11, 4  ;;  %v611_v38 = vpack.c.bf16 %v603_v18, %v603_v18  ;;  %v737_v39 = vrot.slane %v728_v32, 4 }
 0x156   : > { %v605_v37 = vpack.c.bf16 %v597_v33, %v597_v33  ;;  %616 = vst.msk [vmem:[#allocation2 + $0x6] sm:$0x3] %vm612_vm2, %v607_v28  ;;  %2240 = vxpose.binary.xlu2.c.b16.start.end [1/2] (short) (narrow) %v748_v30, %v747_v29, 16  ;;  %v720_v40 = vperm.slane %v712_v35, %v2797_v45 }
 0x157   : > { %617 = vst.msk [vmem:[#allocation2 + $0x8] sm:$0x3] %vm612_vm2, %v608_v20  ;;  %v710_v41 = vsel %vm548_vm1, %v709_v36, %v692_v54  ;;  %v738_v43 = vsel %vm548_vm1, 0.0, %v737_v39  ;;  %v745_v44 = vpack.c.bf16 %v728_v32, %v728_v32 }
 0x158   : > { %614 = vst.msk [vmem:[#allocation2 + $0x2] sm:$0x3] %vm612_vm2, %v605_v37  ;;  %v746_v46 = vpack.c.bf16 %v738_v43, %v738_v43  ;;  %v735_v47 = vrot.slane %v720_v40, 4  ;;  %v716_v48 = vperm.slane %v710_v41, %v2797_v45  ;;  %v831_v50 = vld [vmem:[#allocation2 + $0xc] sm:$0x3]  ;;  %v743_v54 = vpack.c.bf16 %v720_v40, %v720_v40 }
 0x159   : > { %618 = vst.msk [vmem:[#allocation2 + $0xa] sm:$0x3] %vm612_vm2, %v609_v34  ;;  %v850_v59 = vrot.slane %v831_v50, 4 }
 0x15a   : > { %620 = vst.msk [vmem:[#allocation2 + $0xe] sm:$0x3] %vm612_vm2, %v611_v38  ;;  %2237 = vxpose.binary.xlu1.c.b16.start.end [1/2] (short) (narrow) %v746_v46, %v745_v44, 16  ;;  %v736_v51 = vsel %vm548_vm1, 0.0, %v735_v47  ;;  %v733_v58 = vrot.slane %v716_v48, 4  ;;  %v741_v9 = vpack.c.bf16 %v716_v48, %v716_v48  ;;  %v2261_v46 = vpack.i.bf16 %v2785_v31, %v2774_v13 }
 0x15b   : > { %v827_v49 = vld [vmem:[#allocation2 + $0x4] sm:$0x3]  ;;  %v744_v55 = vpack.c.bf16 %v736_v51, %v736_v51 }
 0x15c   : > { %v833_v52 = vrot.slane %v827_v49, 4  ;;  %v825_v56 = vld [vmem:[#allocation2] sm:$0x3]  ;;  %v734_v2 = vsel %vm548_vm1, 0.0, %v733_v58 }
 0x15d   : > { %v828_v57 = vld [vmem:[#allocation2 + $0x6] sm:$0x3]  ;;  %2246 = vxpose.binary.xlu0.c.b16.start.end [1/2] (short) (narrow) %v744_v55, %v743_v54, 16  ;;  %v742_v10 = vpack.c.bf16 %v734_v2, %v734_v2 }
 0x15e   : > { %v835_v60 = vsel %vm548_vm1, %v833_v52, %v825_v56  ;;  %v842_v61 = vrot.slane %v828_v57, 4  ;;  %v829_v62 = vld [vmem:[#allocation2 + $0x8] sm:$0x3] }
 0x15f   : > { %v826_v63 = vld [vmem:[#allocation2 + $0x2] sm:$0x3]  ;;  %v839_v4 = vperm.slane %v835_v60, %v2797_v45  ;;  %v851_v7 = vsel %vm548_vm1, %v850_v59, %v829_v62 }
 0x160   : > { %v843_v0 = vsel %vm548_vm1, %v842_v61, %v826_v63  ;;  %v830_v3 = vld [vmem:[#allocation2 + $0xa] sm:$0x3]  ;;  %v855_v12 = vperm.slane %v851_v7, %v2797_v45 }
 0x161   : > { %v832_v1 = vld [vmem:[#allocation2 + $0xe] sm:$0x3]  ;;  %v847_v5 = vperm.slane %v843_v0, %v2797_v45  ;;  %v869_v18 = vshrl.u32 %v839_v4, 16  ;;  %v840_v26 = vrot.slane %v839_v4, 4 }
 0x162   : > { %v858_v6 = vrot.slane %v832_v1, 4  ;;  %v881_v19 = vshrl.u32 %v855_v12, 16  ;;  %v856_v28 = vrot.slane %v855_v12, 4 }
 0x163   : > { %v868_v8 = vpack.i.b16 %v847_v5, %v839_v4  ;;  %v870_v16 = vshrl.u32 %v847_v5, 16  ;;  %v848_v24 = vrot.slane %v847_v5, 4  ;;  %v841_v32 = vsel %vm548_vm1, 0, %v840_v26 }
 0x164   : > { %v859_v11 = vsel %vm548_vm1, %v858_v6, %v830_v3  ;;  %v857_v33 = vsel %vm548_vm1, 0, %v856_v28  ;;  %v875_v39 = vshrl.u32 %v841_v32, 16 }
 0x165   : > { %v863_v14 = vperm.slane %v859_v11, %v2797_v45  ;;  %1287 = vst [vmem:[#allocation1] ss:$4 sm:$0xff] %v868_v8  ;;  %v871_v20 = vpack.i.b16 %v870_v16, %v869_v18  ;;  %v849_v29 = vsel %vm548_vm1, 0, %v848_v24  ;;  %v887_v40 = vshrl.u32 %v857_v33, 16 }
 0x166   : > { %2243 = vxpose.binary.xlu2.c.b16.start.end [1/2] (short) (narrow) %v742_v10, %v741_v9, 16  ;;  %v874_v34 = vpack.i.b16 %v849_v29, %v841_v32  ;;  %v876_v37 = vshrl.u32 %v849_v29, 16 }
 0x167   : > { %v880_v15 = vpack.i.b16 %v863_v14, %v855_v12  ;;  %v882_v17 = vshrl.u32 %v863_v14, 16  ;;  %v864_v25 = vrot.slane %v863_v14, 4 }
 0x168   : > { %v877_v41 = vpack.i.b16 %v876_v37, %v875_v39 }
 0x169   : > { %1290 = vst [vmem:[#allocation1 + $0x1] ss:$4 sm:$0xff] %v880_v15  ;;  %v883_v22 = vpack.i.b16 %v882_v17, %v881_v19  ;;  %v865_v30 = vsel %vm548_vm1, 0, %v864_v25 }
 0x16a   : > { %v886_v35 = vpack.i.b16 %v865_v30, %v857_v33  ;;  %v888_v38 = vshrl.u32 %v865_v30, 16 }
 0x16c   : > { %v889_v43 = vpack.i.b16 %v888_v38, %v887_v40 }
 0x170   : > { %v2853_v21 = vld.sshfl [vmem:[#allocation1] sm:$0xff pattern:$0x73625140] }
 0x171   : > { %1313 = vst [vmem:[#allocation1] ss:$4 sm:$0xff] %v871_v20 }
 0x172   : > { %1316 = vst [vmem:[#allocation1 + $0x1] ss:$4 sm:$0xff] %v883_v22 }
 0x179   : > { %v2859_v36 = vld.sshfl [vmem:[#allocation1] sm:$0xff pattern:$0x73625140] }
 0x17a   : > { %1337 = vst [vmem:[#allocation1] ss:$4 sm:$0xff] %v874_v34 }
 0x17b   : > { %1340 = vst [vmem:[#allocation1 + $0x1] ss:$4 sm:$0xff] %v886_v35 }
 0x182   : > { %v2861_v44 = vld.sshfl [vmem:[#allocation1] sm:$0xff pattern:$0x73625140] }
 0x183   : > { %1361 = vst [vmem:[#allocation1] ss:$4 sm:$0xff] %v877_v41 }
 0x184   : > { %1364 = vst [vmem:[#allocation1 + $0x1] ss:$4 sm:$0xff] %v889_v43 }
 0x1b4   : > { %2262 = vrot.lane.b32.xlu1 %v2261_v46, %s2563_s24 }
 0x1f7   : > { %v2241_v47 = vpop.trf.xlu2 }
 0x1f8   : > { %v1024_v52 = vrot.slane %v2241_v47, 4 }
 0x1ff   : > { %v2242_v48 = vpop.trf.xlu2 }
 0x200   : > { %v1052_v63 = vrot.slane %v2242_v48, 4 }
 0x206   : > { %v2238_v49 = vpop.trf.xlu1 }
 0x207   : > { %v2244_v50 = vpop.trf.xlu2  ;;  %v1018_v51 = vrot.slane %v2238_v49, 4 }
 0x209   : > { %v2247_v54 = vpop.trf.xlu0  ;;  %v1019_v55 = vsel %vm548_vm1, %v1018_v51, %v2244_v50 }
 0x20a   : > { %v1025_v56 = vsel %vm548_vm1, %v1024_v52, %v2247_v54  ;;  %v1023_v57 = vperm.slane %v1019_v55, %v2780_v27 }
 0x20b   : > { %v1029_v58 = vperm.slane %v1025_v56, %v2780_v27 }
 0x20c   : > { %v1032_v13 = vrot.slane %v1023_v57, 4 }
 0x20d   : > { %v1030_v59 = vrot.slane %v1029_v58, 4 }
 0x20e   : > { %v2239_v31 = vpop.trf.xlu1  ;;  %v1033_v2 = vsel %vm548_vm1, %v1029_v58, %v1032_v13 }
 0x20f   : > { %v2245_v60 = vpop.trf.xlu2  ;;  %v1031_v61 = vsel %vm548_vm1, %v1030_v59, %v1023_v57  ;;  %v1046_v62 = vrot.slane %v2239_v31, 4  ;;  %v1041_v9 = vperm.slane %v1033_v2, %v2797_v45 }
 0x210   : > { %v1037_v3 = vperm.slane %v1031_v61, %v2797_v45 }
 0x211   : > { %v2248_v0 = vpop.trf.xlu0  ;;  %v1047_v1 = vsel %vm548_vm1, %v1046_v62, %v2245_v60  ;;  %v1094_v16 = vshrl.u32 %v1041_v9, 16  ;;  %v1044_v32 = vrot.slane %v1041_v9, 4 }
 0x212   : > { %v1053_v4 = vsel %vm548_vm1, %v1052_v63, %v2248_v0  ;;  %v1051_v5 = vperm.slane %v1047_v1, %v2780_v27  ;;  %v1042_v11 = vrot.slane %v1037_v3, 4  ;;  %v1078_v41 = vshrl.u32 %v1037_v3, 16 }
 0x213   : > { %v1057_v6 = vperm.slane %v1053_v4, %v2780_v27  ;;  %v1045_v34 = vsel %vm548_vm1, 0, %v1044_v32 }
 0x214   : > { %v1060_v7 = vrot.slane %v1051_v5, 4  ;;  %v1043_v18 = vsel %vm548_vm1, 0, %v1042_v11  ;;  %v1102_v37 = vshrl.u32 %v1045_v34, 16 }
 0x215   : > { %v1058_v8 = vrot.slane %v1057_v6, 4  ;;  %v1086_v25 = vshrl.u32 %v1043_v18, 16 }
 0x216   : > { %v1061_v10 = vsel %vm548_vm1, %v1057_v6, %v1060_v7 }
 0x217   : > { %v1059_v12 = vsel %vm548_vm1, %v1058_v8, %v1051_v5  ;;  %v1069_v14 = vperm.slane %v1061_v10, %v2797_v45 }
 0x218   : > { %v1065_v15 = vperm.slane %v1059_v12, %v2797_v45 }
 0x219   : > { %v1095_v17 = vshrl.u32 %v1069_v14, 16  ;;  %v1092_v20 = vpack.i.b16 %v1069_v14, %v1041_v9  ;;  %v1072_v30 = vrot.slane %v1069_v14, 4 }
 0x21a   : > { %v1070_v19 = vrot.slane %v1065_v15, 4  ;;  %v1079_v40 = vshrl.u32 %v1065_v15, 16  ;;  %v1076_v43 = vpack.i.b16 %v1065_v15, %v1037_v3 }
 0x21b   : > { %v1096_v22 = vpack.i.b16 %v1095_v17, %v1094_v16  ;;  %v1073_v33 = vsel %vm548_vm1, 0, %v1072_v30 }
 0x21c   : > { %v1071_v24 = vsel %vm548_vm1, 0, %v1070_v19  ;;  %v1103_v35 = vshrl.u32 %v1073_v33, 16  ;;  %v1100_v38 = vpack.i.b16 %v1073_v33, %v1045_v34  ;;  %v1080_v46 = vpack.i.b16 %v1079_v40, %v1078_v41 }
 0x21d   : > { %2249 = vxpose.binary.xlu0.c.b16.start.end [1/2] (short) (narrow) %v1096_v22, %v1092_v20, 16  ;;  %v1087_v26 = vshrl.u32 %v1071_v24, 16  ;;  %v1084_v28 = vpack.i.b16 %v1071_v24, %v1043_v18  ;;  %v2564_v33 = vmov -inf   ;;  %v2565_v41 = vmov 0  }
 0x21e   : > { %v1104_v39 = vpack.i.b16 %v1103_v35, %v1102_v37  ;;  %622 = vst.msk [vmem:[#allocation3] sm:$0xff] %vm621_vm5, %v2564_v33  ;;  %2272 = vset.pattern.permute.xlu1 %v2565_v41 }
 0x21f   : > { %v1088_v29 = vpack.i.b16 %v1087_v26, %v1086_v25  ;;  %623 = vst.msk [vmem:[#allocation3 + $0x8] sm:$0xff] %vm621_vm5, %v2564_v33 }
 0x220   : > { %624 = vst.msk [vmem:[#allocation3 + $0x10] sm:$0xff] %vm621_vm5, %v2564_v33 }
 0x221   : > { %2252 = vxpose.binary.xlu2.c.b16.start.end [1/2] (short) (narrow) %v1088_v29, %v1084_v28, 16  ;;  %v1365_v28 = vld.sshfl [vmem:[#allocation1] sm:$0xff pattern:$0x73625140]  ;;  %625 = vst.msk [vmem:[#allocation3 + $0x18] sm:$0xff] %vm621_vm5, %v2564_v33 }
 0x225   : > { %v2943_v42 = vld [vmem:[#allocation3] sm:$0xff] }
 0x226   : > { %v2263_v23 = vpop.permute.xlu1 %2262 }
 0x231   : > { %2255 = vxpose.binary.xlu2.c.b16.start.end [1/2] (short) (narrow) %v1104_v39, %v1100_v38, 16 }
 0x241   : > { %2258 = vxpose.binary.xlu2.c.b16.start.end [1/2] (short) (narrow) %v1080_v46, %v1076_v43, 16  ;;  %v2566_v43 = vmov 0.0   ;;  %v2945_v46 = vld [vmem:[#allocation3 + $0x8] sm:$0xff] }
 0x242   : > { %628 = vst.msk [vmem:[#allocation4 + $0x10] sm:$0xff] %vm621_vm5, %v2566_v43 }
 0x243   : > { %626 = vst.msk [vmem:[#allocation4] sm:$0xff] %vm621_vm5, %v2566_v43 }
 0x244   : > { %627 = vst.msk [vmem:[#allocation4 + $0x8] sm:$0xff] %vm621_vm5, %v2566_v43 }
 0x245   : > { %629 = vst.msk [vmem:[#allocation4 + $0x18] sm:$0xff] %vm621_vm5, %v2566_v43 }
 0x246   : > { %631 = vst.msk [vmem:[#allocation5] sm:$0xff] %vm630_vm4, %v2566_v43 }
 0x247   : > { %632 = vst.msk [vmem:[#allocation5 + $0x8] sm:$0xff] %vm630_vm4, %v2566_v43 }
 0x248   : > { %633 = vst.msk [vmem:[#allocation5 + $0x10] sm:$0xff] %vm630_vm4, %v2566_v43 }
 0x249   : > { %634 = vst.msk [vmem:[#allocation5 + $0x18] sm:$0xff] %vm630_vm4, %v2566_v43 }
 0x284   : > { %2273 = vset.pattern.permute.xlu0 %v2565_v41 }
 0x2a3   : > { %2271 = vset.pattern.permute.xlu2 %v2565_v41 }
 0x2c2   : > { %v2253_v47 = vpop.trf.xlu2 }
 0x2c9   : > { %v2250_v52 = vpop.trf.xlu0 }
 0x2ca   : > { %v2254_v48 = vpop.trf.xlu2  ;;  %v1234_v55 = vrot.slane %v2250_v52, 4  ;;  %v2962_v52 = vld [vmem:[#allocation3 + $0x10] sm:$0xff] }
 0x2d1   : > { %v2251_v60 = vpop.trf.xlu0 }
 0x2d2   : > { %v2256_v49 = vpop.trf.xlu2  ;;  %v1254_v63 = vrot.slane %v2251_v60, 4  ;;  %v2264_v60 = vunpack.i.l.bf16 %v2263_v23 }
 0x2d3   : > { %v1240_v50 = vrot.slane %v2256_v49, 4 }
 0x2d5   : > { %v1241_v54 = vsel %vm548_vm1, %v1240_v50, %v2253_v47 }
 0x2d6   : > { %v1245_v56 = vperm.slane %v1241_v54, %v2780_v27 }
 0x2d8   : > { %v1246_v13 = vrot.slane %v1245_v56, 4 }
 0x2da   : > { %v2257_v51 = vpop.trf.xlu2 }
 0x2db   : > { %v1260_v57 = vrot.slane %v2257_v51, 4 }
 0x2dd   : > { %v1261_v61 = vsel %vm548_vm1, %v1260_v57, %v2254_v48 }
 0x2de   : > { %v1265_v0 = vperm.slane %v1261_v61, %v2780_v27 }
 0x2e0   : > { %v1266_v4 = vrot.slane %v1265_v0, 4 }
 0x2e2   : > { %v2259_v58 = vpop.trf.xlu2 }
 0x2e3   : > { %v1235_v59 = vsel %vm548_vm1, %v1234_v55, %v2259_v58  ;;  %v2964_v55 = vld [vmem:[#allocation3 + $0x18] sm:$0xff] }
 0x2e4   : > { %v1239_v31 = vperm.slane %v1235_v59, %v2780_v27 }
 0x2e6   : > { %v1247_v62 = vsel %vm548_vm1, %v1246_v13, %v1239_v31  ;;  %v2265_v31 = vunpack.i.h.bf16 %v2263_v23 }
 0x2e7   : > { %v1251_v1 = vperm.slane %v1247_v62, %v2797_v45 }
 0x2e8   : > { %v775_v62 = vrot.slane %v2265_v31, 4 }
 0x2e9   : > { %v1252_v6 = vrot.slane %v1251_v1, 4  ;;  %v1277_v9 = vshrl.u32 %v1251_v1, 16 }
 0x2ea   : > { %v2260_v2 = vpop.trf.xlu2 }
 0x2eb   : > { %v1255_v3 = vsel %vm548_vm1, %v1254_v63, %v2260_v2  ;;  %v1253_v12 = vsel %vm548_vm1, 0, %v1252_v6  ;;  %v763_v63 = vrot.slane %v2264_v60, 4 }
 0x2ec   : > { %v1259_v5 = vperm.slane %v1255_v3, %v2780_v27  ;;  %v1283_v19 = vshrl.u32 %v1253_v12, 16 }
 0x2ee   : > { %v1267_v7 = vsel %vm548_vm1, %v1266_v4, %v1259_v5 }
 0x2ef   : > { %v1271_v8 = vperm.slane %v1267_v7, %v2797_v45 }
 0x2f1   : > { %v1276_v10 = vpack.i.b16 %v1271_v8, %v1251_v1  ;;  %v1278_v11 = vshrl.u32 %v1271_v8, 16  ;;  %v1272_v14 = vrot.slane %v1271_v8, 4 }
 0x2f3   : > { %v1297_v15 = vsel %vm1295_vm3, %v1276_v10, 0  ;;  %v1279_v16 = vpack.i.b16 %v1278_v11, %v1277_v9  ;;  %v1273_v17 = vsel %vm548_vm1, 0, %v1272_v14 }
 0x2f4   : > { %1306 = vmatpush.bf16.msra.mxu2 %v1297_v15  ;;  %v1282_v18 = vpack.i.b16 %v1273_v17, %v1253_v12  ;;  %v1284_v20 = vshrl.u32 %v1273_v17, 16 }
 0x2f5   : > { %v1321_v22 = vsel %vm1295_vm3, %v1279_v16, 0 }
 0x2f6   : > { %1330 = vmatpush.bf16.msra.mxu3 %v1321_v22  ;;  %v1345_v24 = vsel %vm1295_vm3, %v1282_v18, 0  ;;  %v1285_v25 = vpack.i.b16 %v1284_v20, %v1283_v19 }
 0x2f7   : > { %2082 = vmatmul.msk.bf16.vlgmr.msra.gmra.mxu2 %vm630_vm4, %v2853_v21 }
 0x2f8   : > { %1354 = vmatpush.bf16.msrb.mxu2 %v1345_v24  ;;  %v1369_v26 = vsel %vm1295_vm3, %v1285_v25, 0 }
 0x2f9   : > { %2083 = vmatmul.msk.bf16.vlgmr.msra.gmra.mxu3 %vm630_vm4, %v2859_v36 }
 0x2fa   : > { %1378 = vmatpush.bf16.msrb.mxu3 %v1369_v26 }
 0x307   : > { %2084 = vmatmul.msk.bf16.vlgmr.msrb.gmra.mxu2 %vm630_vm4, %v2861_v44 }
 0x309   : > { %2085 = vmatmul.msk.bf16.vlgmr.msrb.gmra.mxu3 %vm630_vm4, %v1365_v28 }
 0x37a   : > { %v2911_v29 = vpop.f32.mrf.mxu2 }
 0x37b   : > { %v1388_v30 = vsel %vm630_vm4, %v2911_v29, -inf }
 0x37c   : > { %v2915_v32 = vpop.f32.mrf.mxu3  ;;  %1389 = vmax.xlane.f32.xlu2 %v1388_v30 }
 0x37d   : > { %v1391_v21 = vsel %vm630_vm4, %v2915_v32, -inf }
 0x37e   : > { %1392 = vmax.xlane.f32.xlu1 %v1391_v21 }
 0x382   : > { %v1310_v36 = vpop.f32.mrf.mxu2 }
 0x384   : > { %v1334_v44 = vpop.f32.mrf.mxu3 }
 0x38a   : > { %v2923_v34 = vpop.f32.mrf.mxu2 }
 0x38b   : > { %v1394_v35 = vsel %vm630_vm4, %v2923_v34, -inf }
 0x38c   : > { %v2927_v37 = vpop.f32.mrf.mxu3  ;;  %1395 = vmax.xlane.f32.xlu1 %v1394_v35 }
 0x38d   : > { %v1397_v38 = vsel %vm630_vm4, %v2927_v37, -inf }
 0x38e   : > { %1398 = vmax.xlane.f32.xlu0 %v1397_v38 }
 0x392   : > { %v1358_v39 = vpop.f32.mrf.mxu2 }
 0x394   : > { %v1382_v40 = vpop.f32.mrf.mxu3 }
 0x3a2   : > { %2267 = vrot.lane.b32.xlu0 %v2266_v53, %s2563_s24  ;;  %s2471_s24 = sshra.s32 %s1911_s20, 4  ;;  %s2472_s24 = int_to_ptr.hbm [resolvable:$true] %s2471_s24 }
 0x3a3   : > { %p2478_p10 = scmp.lt.s32.totalorder %s2472_s24, %s3158_s10 }
 0x3ef   : > { %v1390_v53 = vpop.xlane.xlu2 %1389 }
 0x3f0   : > { %v2948_v47 = vmax.f32 %v2943_v42, %v1390_v53 }
 0x3f1   : > { %v1393_v48 = vpop.xlane.xlu1 %1392 }
 0x3f2   : > { %v1404_v49 = vsub.f32 %v2943_v42, %v2948_v47  ;;  %1645 = vst.msk [vmem:[#allocation3] sm:$0xff] %vm621_vm5, %v2948_v47  ;;  %v2955_v50 = vmax.f32 %v2945_v46, %v1393_v48 }
 0x3f4   : > { %v1405_v51 = vsub.f32 %v2945_v46, %v2955_v50  ;;  %1646 = vst.msk [vmem:[#allocation3 + $0x8] sm:$0xff] %vm621_vm5, %v2955_v50  ;;  %1423 = vperm.xlu0 %2273, %v2955_v50  }
 0x3ff   : > { %v1396_v54 = vpop.xlane.xlu1 %1395 }
 0x400   : > { %v2967_v56 = vmax.f32 %v2962_v52, %v1396_v54 }
 0x401   : > { %v1399_v57 = vpop.xlane.xlu0 %1398 }
 0x402   : > { %v1406_v58 = vsub.f32 %v2962_v52, %v2967_v56  ;;  %1647 = vst.msk [vmem:[#allocation3 + $0x10] sm:$0xff] %vm621_vm5, %v2967_v56  ;;  %v2974_v59 = vmax.f32 %v2964_v55, %v1399_v57  ;;  %1428 = vperm.xlu2 %2271, %v2967_v56  }
 0x404   : > { %v1407_v13 = vsub.f32 %v2964_v55, %v2974_v59  ;;  %1648 = vst.msk [vmem:[#allocation3 + $0x18] sm:$0xff] %vm621_vm5, %v2974_v59  ;;  %1433 = vperm.xlu1 %2272, %v2974_v59   ;;  %v1450_v59 = vld [vmem:[#allocation4 + $0x10] sm:$0xff] }
 0x40c   : > { %1418 = vperm.xlu1 %2272, %v2948_v47   ;;  %v1412_v47 = vmul.f32 1.442695, %v1406_v58 }
 0x414   : > { %v2268_v61 = vpop.permute.xlu0 %2267 }
 0x415   : > { %v2270_v0 = vunpack.i.h.bf16 %v2268_v61  ;;  %v2269_v1 = vunpack.i.l.bf16 %v2268_v61 }
 0x417   : > { %v773_v2 = vrot.slane %v2270_v0, 4  ;;  %v776_v3 = vsel %vm548_vm1, %v2270_v0, %v775_v62  ;;  %v761_v4 = vrot.slane %v2269_v1, 4  ;;  %v764_v5 = vsel %vm548_vm1, %v2269_v1, %v763_v63 }
 0x418   : > { %v784_v6 = vperm.slane %v776_v3, %v2780_v27  ;;  %v772_v7 = vperm.slane %v764_v5, %v2780_v27 }
 0x419   : > { %v774_v8 = vsel %vm548_vm1, %v773_v2, %v2265_v31  ;;  %v762_v9 = vsel %vm548_vm1, %v761_v4, %v2264_v60 }
 0x41a   : > { %v780_v10 = vperm.slane %v774_v8, %v2780_v27  ;;  %v797_v11 = vrot.slane %v784_v6, 4  ;;  %v768_v12 = vperm.slane %v762_v9, %v2780_v27  ;;  %v799_v14 = vrot.slane %v772_v7, 4 }
 0x41c   : > { %v785_v15 = vrot.slane %v780_v10, 4  ;;  %v787_v16 = vrot.slane %v768_v12, 4  ;;  %v798_v17 = vsel %vm548_vm1, %v797_v11, %v772_v7  ;;  %v800_v18 = vsel %vm548_vm1, %v784_v6, %v799_v14 }
 0x41d   : > { %v804_v19 = vperm.slane %v798_v17, %v2797_v45  ;;  %v808_v20 = vperm.slane %v800_v18, %v2797_v45 }
 0x41e   : > { %v786_v22 = vsel %vm548_vm1, %v785_v15, %v768_v12  ;;  %v788_v24 = vsel %vm548_vm1, %v780_v10, %v787_v16 }
 0x41f   : > { %v792_v25 = vperm.slane %v786_v22, %v2797_v45  ;;  %v796_v26 = vperm.slane %v788_v24, %v2797_v45  ;;  %v813_v28 = vrot.slane %v804_v19, 4  ;;  %v815_v30 = vrot.slane %v808_v20, 4 }
 0x420   : > { %v821_v21 = vpack.c.bf16 %v804_v19, %v804_v19  ;;  %v823_v36 = vpack.c.bf16 %v808_v20, %v808_v20 }
 0x421   : > { %v809_v33 = vrot.slane %v792_v25, 4  ;;  %v811_v44 = vrot.slane %v796_v26, 4  ;;  %v814_v35 = vsel %vm548_vm1, 0.0, %v813_v28  ;;  %v816_v38 = vsel %vm548_vm1, 0.0, %v815_v30 }
 0x422   : > { %v817_v39 = vpack.c.bf16 %v792_v25, %v792_v25  ;;  %v819_v40 = vpack.c.bf16 %v796_v26, %v796_v26  ;;  %v822_v41 = vpack.c.bf16 %v814_v35, %v814_v35  ;;  %v824_v43 = vpack.c.bf16 %v816_v38, %v816_v38 }
 0x423   : > { %v1509_v23 = vrot.slane %v821_v21, 4  ;;  %v1515_v53 = vrot.slane %v823_v36, 4  ;;  %v810_v48 = vsel %vm548_vm1, 0.0, %v809_v33  ;;  %v812_v54 = vsel %vm548_vm1, 0.0, %v811_v44 }
 0x424   : > { %v1529_v57 = vrot.slane %v822_v41, 4  ;;  %v1535_v31 = vrot.slane %v824_v43, 4  ;;  %v818_v60 = vpack.c.bf16 %v810_v48, %v810_v48  ;;  %v820_v61 = vpack.c.bf16 %v812_v54, %v812_v54 }
 0x425   : > { %v1510_v62 = vsel %vm548_vm1, %v1509_v23, %v817_v39  ;;  %v1516_v63 = vsel %vm548_vm1, %v1515_v53, %v819_v40 }
 0x426   : > { %v1520_v0 = vperm.slane %v1516_v63, %v2780_v27  ;;  %v1530_v1 = vsel %vm548_vm1, %v1529_v57, %v818_v60  ;;  %v1536_v2 = vsel %vm548_vm1, %v1535_v31, %v820_v61  ;;  %v1514_v4 = vperm.slane %v1510_v62, %v2780_v27 }
 0x427   : > { %v1540_v3 = vperm.slane %v1536_v2, %v2780_v27  ;;  %v1534_v6 = vperm.slane %v1530_v1, %v2780_v27  ;;  %v1408_v62 = vmul.f32 1.442695, %v1404_v49  ;;  %v1410_v49 = vmul.f32 1.442695, %v1405_v51 }
 0x428   : > { %v1521_v5 = vrot.slane %v1520_v0, 4 }
 0x429   : > { %v1541_v7 = vrot.slane %v1540_v3, 4 }
 0x42a   : > { %v1522_v8 = vsel %vm548_vm1, %v1521_v5, %v1514_v4 }
 0x42b   : > { %v1526_v9 = vperm.slane %v1522_v8, %v2797_v45  ;;  %v1542_v10 = vsel %vm548_vm1, %v1541_v7, %v1534_v6  ;;  %v1449_v8 = vld [vmem:[#allocation4 + $0x8] sm:$0xff] }
 0x42c   : > { %v1546_v11 = vperm.slane %v1542_v10, %v2797_v45 }
 0x42d   : > { %v1527_v12 = vrot.slane %v1526_v9, 4  ;;  %v1552_v15 = vshrl.u32 %v1526_v9, 16 }
 0x42e   : > { %v1551_v14 = vpack.i.b16 %v1546_v11, %v1526_v9  ;;  %v1553_v16 = vshrl.u32 %v1546_v11, 16  ;;  %v1547_v17 = vrot.slane %v1546_v11, 4  ;;  %v1451_v11 = vld [vmem:[#allocation4 + $0x18] sm:$0xff] }
 0x42f   : > { %v1528_v18 = vsel %vm548_vm1, 0, %v1527_v12 }
 0x430   : > { %v1565_v19 = vsel %vm1295_vm3, %v1551_v14, 0  ;;  %v1554_v20 = vpack.i.b16 %v1553_v16, %v1552_v15  ;;  %v1548_v22 = vsel %vm548_vm1, 0, %v1547_v17  ;;  %v1558_v25 = vshrl.u32 %v1528_v18, 16 }
 0x431   : > { %1574 = vmatpush.bf16.msrb.mxu0 %v1565_v19  ;;  %v1557_v24 = vpack.i.b16 %v1548_v22, %v1528_v18  ;;  %v1559_v26 = vshrl.u32 %v1548_v22, 16  ;;  %v1448_v19 = vld [vmem:[#allocation4] sm:$0xff] }
 0x432   : > { %v1584_v28 = vsel %vm1295_vm3, %v1554_v20, 0 }
 0x433   : > { %1593 = vmatpush.bf16.msrb.mxu1 %v1584_v28  ;;  %v1603_v30 = vsel %vm1295_vm3, %v1557_v24, 0  ;;  %v1560_v21 = vpack.i.b16 %v1559_v26, %v1558_v25  ;;  %v1479_v26 = vld [vmem:[#allocation5 + $0x10] sm:$0xff]  ;;  %v1477_v28 = vld [vmem:[#allocation5] sm:$0xff] }
 0x434   : > { %1612 = vmatpush.bf16.msra.mxu2 %v1603_v30 }
 0x435   : > { %v1622_v36 = vsel %vm1295_vm3, %v1560_v21, 0 }
 0x436   : > { %1631 = vmatpush.bf16.msra.mxu3 %v1622_v36 }
 0x45c   : > { %v1429_v33 = vpop.permute.xlu2 %1428 }
 0x45d   : > { %v1438_v44 = vsub.f32 %v2923_v34, %v1429_v33 }
 0x45f   : > { %v1444_v35 = vmul.f32 1.442695, %v1438_v44 }
 0x461   : > { %2279 = vpow2.f32 %v1444_v35  ;;  %v1480_v35 = vld [vmem:[#allocation5 + $0x18] sm:$0xff] }
 0x466   : > { %v1424_v38 = vpop.permute.xlu0 %1423 }
 0x467   : > { %v2280_v39 = vpop.eup %2279  ;;  %v1437_v40 = vsub.f32 %v2915_v32, %v1424_v38 }
 0x468   : > { %v1507_v41 = vpack.c.bf16 %v2280_v39, %v2280_v39  ;;  %v1462_v43 = vsel %vm630_vm4, %v2280_v39, 0.0 }
 0x469   : > { %v1442_v23 = vmul.f32 1.442695, %v1437_v40  ;;  %1463 = vadd.xlane.f32.xlu1 %v1462_v43 }
 0x46a   : > { %2088 = vmatmul.msk.bf16.vlgmr.msra.gmra.mxu2 %vm630_vm4, %v1507_v41 }
 0x46b   : > { %2281 = vpow2.f32 %v1442_v23 }
 0x471   : > { %v2282_v53 = vpop.eup %2281 }
 0x472   : > { %v1459_v48 = vsel %vm630_vm4, %v2282_v53, 0.0  ;;  %v1506_v54 = vpack.c.bf16 %v2282_v53, %v2282_v53 }
 0x473   : > { %1460 = vadd.xlane.f32.xlu1 %v1459_v48 }
 0x474   : > { %2087 = vmatmul.msk.bf16.vlgmr.msrb.gmra.mxu1 %vm630_vm4, %v1506_v54  ;;  %v1478_v54 = vld [vmem:[#allocation5 + $0x8] sm:$0xff] }
 0x476   : > { %v1434_v34 = vpop.permute.xlu1 %1433 }
 0x477   : > { %v1439_v57 = vsub.f32 %v2927_v37, %v1434_v34 }
 0x479   : > { %v1446_v31 = vmul.f32 1.442695, %v1439_v57 }
 0x47b   : > { %2283 = vpow2.f32 %v1446_v31 }
 0x47e   : > { %v1419_v32 = vpop.permute.xlu1 %1418 }
 0x47f   : > { %v1436_v60 = vsub.f32 %v2911_v29, %v1419_v32  ;;  %v1414_v29 = vmul.f32 1.442695, %v1407_v13 }
 0x481   : > { %v2284_v61 = vpop.eup %2283  ;;  %v1440_v63 = vmul.f32 1.442695, %v1436_v60 }
 0x482   : > { %v1508_v0 = vpack.c.bf16 %v2284_v61, %v2284_v61  ;;  %v1465_v1 = vsel %vm630_vm4, %v2284_v61, 0.0 }
 0x483   : > { %2285 = vpow2.f32 %v1440_v63  ;;  %1466 = vadd.xlane.f32.xlu0 %v1465_v1 }
 0x484   : > { %2089 = vmatmul.msk.bf16.vlgmr.msra.gmra.mxu3 %vm630_vm4, %v1508_v0  ;;  %2287 = vpow2.f32 %v1408_v62 }
 0x485   : > { %2289 = vpow2.f32 %v1414_v29 }
 0x486   : > { %2291 = vpow2.f32 %v1412_v47 }
 0x487   : > { %2293 = vpow2.f32 %v1410_v49 }
 0x489   : > { %v2286_v37 = vpop.eup %2285 }
 0x48a   : > { %v1456_v2 = vsel %vm630_vm4, %v2286_v37, 0.0  ;;  %v1505_v3 = vpack.c.bf16 %v2286_v37, %v2286_v37  ;;  %v2288_v4 = vpop.eup %2287 }
 0x48b   : > { %1457 = vadd.xlane.f32.xlu2 %v1456_v2  ;;  %v2290_v42 = vpop.eup %2289  ;;  %v1452_v20 = vmul.f32 %v2288_v4, %v1448_v19 }
 0x48c   : > { %1483 = vperm.xlu1 %2272, %v2288_v4   ;;  %2086 = vmatmul.msk.bf16.vlgmr.msrb.gmra.mxu0 %vm630_vm4, %v1505_v3  ;;  %v2292_v5 = vpop.eup %2291  ;;  %v1455_v14 = vmul.f32 %v2290_v42, %v1451_v11 }
 0x48d   : > { %v2294_v55 = vpop.eup %2293  ;;  %v1454_v13 = vmul.f32 %v2292_v5, %v1450_v59 }
 0x48e   : > { %v1453_v9 = vmul.f32 %v2294_v55, %v1449_v8 }
 0x497   : > { %1498 = vperm.xlu0 %2273, %v2290_v42  }
 0x4a3   : > { %1493 = vperm.xlu2 %2271, %v2292_v5  }
 0x4ab   : > { %1488 = vperm.xlu2 %2271, %v2294_v55  }
 0x4dc   : > { %v1464_v6 = vpop.xlane.xlu1 %1463 }
 0x4dd   : > { %v1470_v7 = vadd.f32 %v1464_v6, %v1454_v13 }
 0x4df   : > { %1475 = vst.msk [vmem:[#allocation4 + $0x10] sm:$0xff] %vm621_vm5, %v1470_v7 }
 0x4e6   : > { %v1461_v52 = vpop.xlane.xlu1 %1460  ;;  %v1658_v56 = vld [vmem:[#allocation4 + $0x10] sm:$0xff] }
 0x4e7   : > { %v1469_v58 = vadd.f32 %v1461_v52, %v1453_v9  ;;  %2295 = vrcp.f32 %v1658_v56 }
 0x4e9   : > { %1474 = vst.msk [vmem:[#allocation4 + $0x8] sm:$0xff] %vm621_vm5, %v1469_v58 }
 0x4ed   : > { %v2296_v46 = vpop.eup %2295  ;;  %v1614_v50 = vpop.f32.mrf.mxu2 }
 0x4ee   : > { %1676 = vperm.xlu0 %2273, %v2296_v46  }
 0x4f0   : > { %v1657_v51 = vld [vmem:[#allocation4 + $0x8] sm:$0xff] }
 0x4f1   : > { %v1595_v10 = vpop.f32.mrf.mxu1  ;;  %2297 = vrcp.f32 %v1657_v51 }
 0x4f5   : > { %v1616_v12 = vpop.f32.mrf.mxu2 }
 0x4f6   : > { %v1467_v15 = vpop.xlane.xlu0 %1466 }
 0x4f7   : > { %v2298_v16 = vpop.eup %2297  ;;  %v1471_v17 = vadd.f32 %v1467_v15, %v1455_v14 }
 0x4f8   : > { %1671 = vperm.xlu0 %2273, %v2298_v16  }
 0x4f9   : > { %1476 = vst.msk [vmem:[#allocation4 + $0x18] sm:$0xff] %vm621_vm5, %v1471_v17  ;;  %v1597_v18 = vpop.f32.mrf.mxu1 }
 0x4fe   : > { %v1458_v22 = vpop.xlane.xlu2 %1457  ;;  %v1484_v30 = vpop.permute.xlu1 %1483 }
 0x4ff   : > { %v1468_v24 = vadd.f32 %v1458_v22, %v1452_v20  ;;  %v1501_v38 = vmul.f32 %v1484_v30, %v1477_v28 }
 0x500   : > { %v1659_v25 = vld [vmem:[#allocation4 + $0x18] sm:$0xff] }
 0x501   : > { %1473 = vst.msk [vmem:[#allocation4] sm:$0xff] %vm621_vm5, %v1468_v24  ;;  %2299 = vrcp.f32 %v1659_v25 }
 0x506   : > { %v1494_v21 = vpop.permute.xlu2 %1493 }
 0x507   : > { %v2300_v36 = vpop.eup %2299  ;;  %v1503_v33 = vmul.f32 %v1494_v21, %v1479_v26  ;;  %v1633_v44 = vpop.f32.mrf.mxu3 }
 0x508   : > { %1681 = vperm.xlu2 %2271, %v2300_v36   ;;  %v1656_v39 = vld [vmem:[#allocation4] sm:$0xff] }
 0x509   : > { %v1639_v40 = vadd.f32 %v1614_v50, %v1503_v33  ;;  %v1499_v41 = vpop.permute.xlu0 %1498  ;;  %v1576_v43 = vpop.f32.mrf.mxu0  ;;  %2301 = vrcp.f32 %v1656_v39 }
 0x50a   : > { %v1504_v23 = vmul.f32 %v1499_v41, %v1480_v35  ;;  %v1637_v53 = vadd.f32 %v1576_v43, %v1501_v38 }
 0x50b   : > { %1643 = vst.msk [vmem:[#allocation5 + $0x10] sm:$0xff] %vm630_vm4, %v1639_v40 }
 0x50c   : > { %v1640_v48 = vadd.f32 %v1633_v44, %v1504_v23  ;;  %1641 = vst.msk [vmem:[#allocation5] sm:$0xff] %vm630_vm4, %v1637_v53 }
 0x50e   : > { %1644 = vst.msk [vmem:[#allocation5 + $0x18] sm:$0xff] %vm630_vm4, %v1640_v48  ;;  %v1489_v34 = vpop.permute.xlu2 %1488 }
 0x50f   : > { %v2302_v57 = vpop.eup %2301  ;;  %v1502_v31 = vmul.f32 %v1489_v34, %v1478_v54  ;;  %v1635_v32 = vpop.f32.mrf.mxu3 }
 0x510   : > { %1666 = vperm.xlu1 %2272, %v2302_v57  }
 0x511   : > { %v1638_v60 = vadd.f32 %v1595_v10, %v1502_v31  ;;  %v1578_v61 = vpop.f32.mrf.mxu0 }
 0x512   : > { %v1654_v42 = vld [vmem:[#allocation5 + $0x10] sm:$0xff] }
 0x513   : > { %1642 = vst.msk [vmem:[#allocation5 + $0x8] sm:$0xff] %vm630_vm4, %v1638_v60  ;;  %v1652_v59 = vld [vmem:[#allocation5] sm:$0xff] }
 0x515   : > { %v1655_v1 = vld [vmem:[#allocation5 + $0x18] sm:$0xff] }
 0x51a   : > { %v1653_v37 = vld [vmem:[#allocation5 + $0x8] sm:$0xff] }
 0x560   : > { %v1677_v62 = vpop.permute.xlu0 %1676 }
 0x561   : > { %v1686_v47 = vmul.f32 %v1677_v62, %v1654_v42 }
 0x562   : > { %v1682_v63 = vpop.permute.xlu2 %1681 }
 0x563   : > { %v1687_v2 = vmul.f32 %v1682_v63, %v1655_v1  ;;  %v1688_v6 = vrot.slane %v1686_v47, 4 }
 0x565   : > { %v1700_v4 = vrot.slane %v1687_v2, 4 }
 0x56a   : > { %v1672_v0 = vpop.permute.xlu0 %1671 }
 0x56b   : > { %v1685_v3 = vmul.f32 %v1672_v0, %v1653_v37 }
 0x56d   : > { %v1702_v29 = vrot.slane %v1685_v3, 4  ;;  %v1701_v49 = vsel %vm548_vm1, %v1700_v4, %v1685_v3 }
 0x56e   : > { %v1707_v55 = vperm.slane %v1701_v49, %v2780_v27  ;;  %v2108_v49 = vld [vmem:[#allocation14 + $0x8] sm:$0xff] }
 0x56f   : > { %v1703_v5 = vsel %vm548_vm1, %v1687_v2, %v1702_v29  ;;  %1845 = vmatpush.bf16.msra.mxu0 %v2108_v49 }
 0x570   : > { %v1711_v8 = vperm.slane %v1703_v5, %v2780_v27  ;;  %v1712_v56 = vrot.slane %v1707_v55, 4  ;;  %v2107_v5 = vld [vmem:[#allocation14] sm:$0xff] }
 0x572   : > { %v1724_v50 = vrot.slane %v1711_v8, 4 }
 0x573   : > { %1846 = vmatpush.bf16.msra.mxu0 %v2107_v5 }
 0x582   : > { %v1667_v13 = vpop.permute.xlu1 %1666 }
 0x583   : > { %v1684_v7 = vmul.f32 %v1667_v13, %v1652_v59 }
 0x585   : > { %v1689_v9 = vsel %vm548_vm1, %v1688_v6, %v1684_v7  ;;  %v1690_v52 = vrot.slane %v1684_v7, 4 }
 0x586   : > { %v1695_v58 = vperm.slane %v1689_v9, %v2780_v27  ;;  %v2276_v9 = vld [vmem:[%s3155_s7] ss:$0 sm:$0xff] }
 0x587   : > { %v1691_v46 = vsel %vm548_vm1, %v1686_v47, %v1690_v52 }
 0x588   : > { %v1699_v51 = vperm.slane %v1691_v46, %v2780_v27  ;;  %v1713_v10 = vsel %vm548_vm1, %v1712_v56, %v1695_v58  ;;  %v1714_v11 = vrot.slane %v1695_v58, 4  ;;  %v1852_v56 = vld [vmem:[%s424_s13] sm:$0xff] }
 0x589   : > { %v1719_v12 = vperm.slane %v1713_v10, %v2797_v45  ;;  %v2570_v10 = vmov 32.0  }
 0x58a   : > { %v1715_v14 = vsel %vm548_vm1, %v1707_v55, %v1714_v11  ;;  %v1725_v15 = vsel %vm548_vm1, %v1724_v50, %v1699_v51  ;;  %v1726_v16 = vrot.slane %v1699_v51, 4  ;;  %2303 = vrcp.f32 %v2570_v10 }
 0x58b   : > { %v1723_v17 = vperm.slane %v1715_v14, %v2797_v45  ;;  %v1731_v18 = vperm.slane %v1725_v15, %v2797_v45  ;;  %v1736_v22 = vrot.slane %v1719_v12, 4 }
 0x58c   : > { %v1727_v19 = vsel %vm548_vm1, %v1711_v8, %v1726_v16 }
 0x58d   : > { %v1735_v20 = vperm.slane %v1727_v19, %v2797_v45  ;;  %v1738_v24 = vrot.slane %v1723_v17, 4  ;;  %v1740_v26 = vrot.slane %v1731_v18, 4  ;;  %v1737_v33 = vsel %vm548_vm1, 0.0, %v1736_v22 }
 0x58f   : > { %v1739_v25 = vsel %vm548_vm1, 0.0, %v1738_v24  ;;  %v1742_v28 = vrot.slane %v1735_v20, 4  ;;  %v1744_v30 = vsel %vm548_vm1, %v1738_v24, %v1719_v12  ;;  %v1741_v43 = vsel %vm548_vm1, 0.0, %v1740_v26 }
 0x590   : > { %v1749_v21 = vrot.slane %v1739_v25, 4  ;;  %v1748_v36 = vperm.slane %v1744_v30, %v2780_v27  ;;  %v2304_v11 = vpop.eup %2303 }
 0x591   : > { %v1743_v44 = vsel %vm548_vm1, 0.0, %v1742_v28  ;;  %v1755_v35 = vsel %vm548_vm1, %v1742_v28, %v1731_v18  ;;  %v1858_v12 = vmul.f32 32.0, %v2304_v11  ;;  %vm1862_vm8 = vweird.f32 %v2304_v11 }
 0x592   : > { %v1750_v38 = vsel %vm548_vm1, %v1749_v21, %v1737_v33  ;;  %v1759_v39 = vperm.slane %v1755_v35, %v2780_v27  ;;  %v1760_v40 = vrot.slane %v1743_v44, 4  ;;  %v1768_v41 = vrot.slane %v1748_v36, 4 }
 0x593   : > { %v1754_v23 = vperm.slane %v1750_v38, %v2780_v27  ;;  %v1859_v14 = vsub.f32 1.0, %v1858_v12  ;;  %v2277_v38 = vld [vmem:[%s3156_s8] ss:$0 sm:$0xff] }
 0x594   : > { %v1761_v53 = vsel %vm548_vm1, %v1760_v40, %v1741_v43  ;;  %v1780_v48 = vrot.slane %v1759_v39, 4 }
 0x595   : > { %v1765_v54 = vperm.slane %v1761_v53, %v2780_v27  ;;  %v1769_v34 = vsel %vm548_vm1, %v1754_v23, %v1768_v41  ;;  %v1766_v57 = vrot.slane %v1754_v23, 4  ;;  %v1860_v15 = vmul.f32 %v2304_v11, %v1859_v14  ;;  %v2278_v41 = vld [vmem:[%s3187_s2] ss:$0 sm:$0xff] }
 0x596   : > { %v1777_v31 = vperm.slane %v1769_v34, %v2797_v45 }
 0x597   : > { %v1781_v32 = vsel %vm548_vm1, %v1765_v54, %v1780_v48  ;;  %v1767_v60 = vsel %vm548_vm1, %v1766_v57, %v1748_v36  ;;  %v1778_v61 = vrot.slane %v1765_v54, 4  ;;  %v1861_v16 = vadd.f32 %v2304_v11, %v1860_v15 }
 0x598   : > { %v1789_v62 = vperm.slane %v1781_v32, %v2797_v45  ;;  %v1796_v63 = vrot.slane %v1777_v31, 4  ;;  %v1773_v0 = vperm.slane %v1767_v60, %v2797_v45 }
 0x599   : > { %v1779_v1 = vsel %vm548_vm1, %v1778_v61, %v1759_v39  ;;  %v1863_v17 = vsel %vm1862_vm8, %v2304_v11, %v1861_v16 }
 0x59a   : > { %v1797_v37 = vsel %vm548_vm1, %v1789_v62, %v1796_v63  ;;  %v1794_v27 = vrot.slane %v1789_v62, 4  ;;  %v1785_v2 = vperm.slane %v1779_v1, %v2797_v45  ;;  %v1792_v3 = vrot.slane %v1773_v0, 4 }
 0x59b   : > { %1807 = vrot.lane.b32.xlu0 %v1797_v37, %s2567_s27  ;;  %s2473_s27 = scalar_lea.hbm %s2472_s24, 8 }
 0x59c   : > { %v1795_v4 = vsel %vm548_vm1, %v1794_v27, %v1777_v31  ;;  %v1790_v29 = vrot.slane %v1785_v2, 4  ;;  %v1793_v42 = vsel %vm548_vm1, %v1785_v2, %v1792_v3  ;;  %p2474_p1 = scmp.ne.s32.totalorder %s2472_s24, %s2473_s27  ;;  %p2479_p11 = scmp.lt.s32.totalorder %s2477_s11, %s2473_s27 }
 0x59d   : > { %1803 = vrot.lane.b32.xlu2 %v1795_v4, %s2568_s28  ;;  %1799 = vrot.lane.b32.xlu1 %v1793_v42, %s2569_s26 }
 0x59e   : > { %v1791_v47 = vsel %vm548_vm1, %v1790_v29, %v1773_v0  ;;  %p2475_p3 = pnand %p2474_p1, %p2713_p4  ;;  %p2480_p12 = por %p2479_p11, %p2478_p10 }
 0x5a0   : > { %p2476_p9 = pneg %p2475_p3 }
 0x5a2   : > { %p2481_p13 = pnand %p2480_p12, %p2476_p9 }
 0x5f7   : > { %v1804_v55 = vpop.permute.xlu2 %1803 }
 0x60d   : > { %v1808_v13 = vpop.permute.xlu0 %1807 }
 0x60f   : > { %v1800_v45 = vpop.permute.xlu1 %1799 }
 0x610   : > { %v1810_v59 = vsel %vm630_vm4, %v1791_v47, %v1800_v45 }
 0x611   : > { %v1812_v6 = vsel %vm1811_vm6, %v1810_v59, %v1804_v55 }
 0x612   : > { %v1814_v7 = vsel %vm1813_vm7, %v1812_v6, %v1808_v13 }
 0x613   : > { %v1815_v8 = vpack.c.bf16 %v1814_v7, %v1814_v7 }
 0x615   : > { %2098 = vmatmul.msk.bf16.vlgmr.msra.gmra.mxu0 %vm519_vm0, %v1815_v8 }
 0x692   : > { %v1848_v52 = vpop.f32.mrf.mxu0 }
 0x693   : > { %v1849_v58 = vadd.f32 %v2276_v9, %v1848_v52 }
 0x695   : > { %v1853_v46 = vadd.f32 %v1852_v56, %v1849_v58 }
 0x697   : > { %v1854_v50 = vsel %vm519_vm0, %v1853_v46, 0.0 }
 0x698   : > { %1855 = vadd.xlane.f32.xlu1 %v1854_v50 }
 0x69a   : > { %v1850_v51 = vpop.f32.mrf.mxu0 }
 0x70b   : > { %v1856_v18 = vpop.xlane.xlu1 %1855 }
 0x70c   : > { %v1864_v19 = vmul.f32 %v1863_v17, %v1856_v18 }
 0x70e   : > { %v1865_v20 = vsub.f32 %v1853_v46, %v1864_v19 }
 0x710   : > { %v1866_v22 = vmul.f32 %v1865_v20, %v1865_v20 }
 0x712   : > { %v1867_v24 = vsel %vm519_vm0, %v1866_v22, 0.0 }
 0x713   : > { %1868 = vadd.xlane.f32.xlu2 %v1867_v24 }
 0x786   : > { %v1869_v25 = vpop.xlane.xlu2 %1868 }
 0x787   : > { %v1870_v26 = vmul.f32 %v1869_v25, %v1863_v17 }
 0x789   : > { %v1871_v28 = vadd.f32 1e-05, %v1870_v26 }
 0x78b   : > { %2305 = vrsqrt.f32 %v1871_v28  ;;  %vm1878_vm10 = vweird.f32 %v1871_v28 }
 0x791   : > { %v2306_v30 = vpop.eup %2305 }
 0x792   : > { %v1873_v21 = vmul.f32 %v2306_v30, %v1871_v28  ;;  %vm1879_vm9 = vweird.f32 %v2306_v30 }
 0x793   : > { %vm1880_vm11 = vmor %vm1878_vm10, %vm1879_vm9 }
 0x794   : > { %v1874_v36 = vmul.f32 %v2306_v30, %v1873_v21 }
 0x796   : > { %v1875_v33 = vmul.f32 0.5, %v1874_v36 }
 0x798   : > { %v1876_v44 = vsub.f32 1.5, %v1875_v33 }
 0x79a   : > { %v1877_v35 = vmul.f32 %v2306_v30, %v1876_v44 }
 0x79c   : > { %v1881_v39 = vsel %vm1880_vm11, %v2306_v30, %v1877_v35 }
 0x79d   : > { %v1882_v40 = vmul.f32 %v1881_v39, %v1865_v20 }
 0x79f   : > { %v1887_v43 = vmul.f32 %v2277_v38, %v1882_v40 }
 0x7a1   : > { %v1892_v23 = vadd.f32 %v2278_v41, %v1887_v43 }
 0x7a3   : > { %1893 = vst.msk [vmem:[%s491_s16] sm:$0xff] %vm519_vm0, %v1892_v23 }
 0x7a4   : > { %2484 = shalt.err (!%p2481_p13)
}
 0x7a5   : > { %2125 = dma.vmem_to_hbm [thread:$0]  (%p2713_p4), %s1909_s30, 128, %s1911_s20, %s1895_s21  }
 0x7a6 PF: > { %s3188_s29 = sld [smem:[#allocation21_spill]]  ;;  %p2145_p0 = pnand %p2052_p6, %p2721_p7 }
 0x7a8   : > { %p2146_p2 = pneg %p2145_p0 }
 0x7ac   : > { %s1922_s6 = sand.u32 1, %s3188_s29  }
 0x7ad   : > { %s1923_s13 = scalar_lea.sflag [#allocation8], %s1922_s6 }
 0x7ae   : > { %2526 = dma.done.wait (%p2146_p2), %s1923_s13, 128  }
 0x7af   : > { %2528 = vsyncadd (%p2146_p2), %s1923_s13, 4294967168  ;;  %s30_s18 = sadd.s32 1, %s2551_s18   ;;  %s3190_s9 = sld [smem:[#allocation22_spill]] }
 0x7b0   : > { %p27_p5 = scmp.ge.s32.totalorder %s30_s18, 4   ;;  %s3191_s15 = sld [smem:[#allocation26_spill]] }
 0x7b1   : > { %s3192_s16 = sld [smem:[#allocation23_spill]]  ;;  %s3194_s13 = smov %s2535_s14 }
 0x7b2   : > { %s3193_s17 = sld [smem:[#allocation24_spill]]  ;;  %29 = sbr.rel (!%p27_p5) target bundleno = 14 (0xe), region = 142 }
 0x7b5   : > { %s3195_s14 = smov %s3190_s9 }
 0x7b7   :  { %1929 = vsyncpa [#allocation7], 1 }
 0x7b8   :  { %1931 = vsyncpa [#allocation7 + $0x1], 1 }
 0x7b9   :  { %1932 = vsyncpa [#allocation10], 1 }
 0x7ba   :  { %1934 = vsyncpa [#allocation10 + $0x1], 1 }
 0x7bb   :  { %1935 = vsyncpa [#allocation13], 1 }
 0x7bc   :  { %1936 = vsyncpa [#allocation8], 1 }
 0x7bd   :  { %1938 = vsyncpa [#allocation8 + $0x1], 1 }

</bundles_post_ra>
